<compile_context>
chip_gen: v6e
topology: v6e:2x2x1
jax: 0.10.0
libtpu: 0.0.40
codegen_flags: <defaults>
</compile_context>

<pallas_src>
import math
import numpy as np
import jax
import jax.numpy as jnp
from jax import lax
from jax.experimental import pallas as pl
from jax.experimental.pallas import tpu as pltpu


def _round_up(x, m):
    return ((x + m - 1) // m) * m


# ---------------------------------------------------------------------------
# Host-side precomputation (matches the PyTorch __init__).
# ---------------------------------------------------------------------------
def precompute_projection(lap, K):
    V = lap.shape[0]
    polys = [np.eye(V, dtype=np.float32)]
    if K > 1:
        polys.append(lap.astype(np.float32))
        for _ in range(2, K):
            polys.append(2.0 * lap @ polys[-1] - polys[-2])
    proj = np.stack(polys[:K], axis=0)                       # (K, V, V)
    proj = np.transpose(proj, (0, 2, 1)).reshape(K * V, V)   # permute(0,2,1).reshape
    return proj


def get_index(size, out_channels, in_channels):
    x_mid = (size - 1) / 2
    x = np.arange(size) - x_mid
    distance = np.sqrt(x[None, None, :] ** 2 + x[None, :, None] ** 2
                       + x[:, None, None] ** 2)
    unique, ind = np.unique(distance, return_inverse=True)
    n_unique = len(unique)
    ind3 = ind.reshape(size, size, size)
    onehot = np.zeros((size, size, size, n_unique), dtype=np.float32)
    for i in range(n_unique):
        onehot[..., i][ind3 == i] = 1.0
    weight_tmp = np.broadcast_to(
        onehot, (out_channels, in_channels, size, size, size, n_unique)).copy()
    return weight_tmp, ind3, distance


def init_params(lap, in_channels, out_channels, kernel_sizeSph, kernel_sizeSpa,
                key, bias=True, isoSpa=True):
    K, S = kernel_sizeSph, kernel_sizeSpa
    projector = precompute_projection(np.asarray(lap), K)            # (K*V, V)
    k_sph, k_spa = jax.random.split(key)
    std_sph = math.sqrt(2.0 / (in_channels * K))
    weightSph = std_sph * jax.random.normal(
        k_sph, (out_channels, in_channels * K, 1, 1, 1), dtype=jnp.float32)
    if isoSpa:
        weight_tmp, _, _ = get_index(S, out_channels, in_channels)
        n_unique = weight_tmp.shape[-1]
        std_spa = math.sqrt(2.0 / (in_channels * S ** 3))
        weightSpa = std_spa * jax.random.normal(
            k_spa, (out_channels, in_channels, 1, 1, 1, n_unique), dtype=jnp.float32)
        weight_tmp = jnp.asarray(weight_tmp)
    else:
        weight_tmp = None
        std_spa = math.sqrt(2.0 / (in_channels * S ** 3))
        weightSpa = std_spa * jax.random.normal(
            k_spa, (out_channels, in_channels, S, S, S), dtype=jnp.float32)
    b = jnp.full((out_channels,), 0.01, dtype=jnp.float32) if bias else None
    return dict(projector=jnp.asarray(projector), weightSph=weightSph,
                weightSpa=weightSpa, weight_tmp=weight_tmp, bias=b,
                K=K, S=S, Cout=out_channels, isoSpa=isoSpa)


def _assemble_conv_weight(params, Fin):
    """(Cout, Fin*K, S, S, S) effective conv weight — tiny, pure JAX glue."""
    weightSph, weightSpa = params["weightSph"], params["weightSpa"]
    weight_tmp = params["weight_tmp"]
    K, S, Cout, isoSpa = params["K"], params["S"], params["Cout"], params["isoSpa"]
    C = Fin * K
    if S > 1:
        wSph = jnp.broadcast_to(weightSph, (Cout, C, S, S, S))
        if isoSpa:
            weightSpa_eff = jnp.sum(weight_tmp * weightSpa, -1)       # (Cout,Fin,S,S,S)
        else:
            weightSpa_eff = weightSpa
        wSpa = jnp.broadcast_to(weightSpa_eff[:, :, None],
                                (Cout, Fin, K, S, S, S)).reshape(Cout, C, S, S, S)
        return wSph * wSpa
    return weightSph.reshape(Cout, C, 1, 1, 1)


# ---------------------------------------------------------------------------
# Fused Pallas forward pass (mirrors SO3SE3Conv.se3so3_conv).
# ---------------------------------------------------------------------------
def so3se3_conv_forward(inputs, params):
    projector = params["projector"]
    bias = params["bias"]
    K, S, Cout = params["K"], params["S"], params["Cout"]

    B, Fin, V, X, Y, Z = inputs.shape
    C = Fin * K
    S3 = S * S * S

    # TODO(synk): torch's padding='same' with even kernel_sizeSpa pads
    # asymmetrically; only odd kernel_sizeSpa is supported here.
    assert S % 2 == 1, "even kernel_sizeSpa (asymmetric 'same' padding) unsupported"
    p = (S - 1) // 2
    Xp, Yp, Zp = X + 2 * p, Y + 2 * p, Z + 2 * p

    # Flat-spatial geometry: the padded volume is flattened row-major so every
    # conv tap (dx,dy,dz) becomes a contiguous lane-slice of length L_out at
    # offset dx*Yp*Zp + dy*Zp + dz.  Extra zero tail so all tap windows fit and
    # the output columns are a multiple of 128 (lane-dense stores).
    L_out = _round_up(X * Yp * Zp, 128)
    max_off = (S - 1) * (Yp * Zp + Zp + 1)
    Lp_in = _round_up(max(Xp * Yp * Zp, max_off + L_out), 128)

    # TODO(synk): very large volumes (Fin*V*Lp_in bf16 block approaching v7x's
    # 64 MiB VMEM) would need an L-tile grid axis with a max_off halo; not
    # needed at these shapes.

    # --- glue: spatial zero-pad, flatten, zero tail, cast to bf16 (input-sized) ---
    x_sp = jnp.pad(inputs, ((0, 0), (0, 0), (0, 0), (p, p), (p, p), (p, p)))
    x_fl = x_sp.reshape(B, Fin, V, Xp * Yp * Zp)
    x_fl = jnp.pad(x_fl, ((0, 0), (0, 0), (0, 0), (0, Lp_in - Xp * Yp * Zp)))
    x_fl = x_fl.astype(jnp.bfloat16)

    # per-vertex projector slices: p_r[v, k, v'] = T_k[v', v]
    p_r = projector.reshape(K, V, V).transpose(1, 0, 2).astype(jnp.bfloat16)

    # --- glue: assemble the (tiny) SE(3) conv weight, tap-major column order ---
    weight = _assemble_conv_weight(params, Fin)                    # (Cout, C, S, S, S)
    # w_flat[o, t*C + c] = weight[o, c, dx, dy, dz] with t = dx*S^2 + dy*S + dz
    w_flat = jnp.transpose(weight, (0, 2, 3, 4, 1)).reshape(Cout, S3 * C)
    w_flat = w_flat.astype(jnp.bfloat16)

    tap_offsets = [dx * Yp * Zp + dy * Zp + dz
                   for dx in range(S) for dy in range(S) for dz in range(S)]

    has_bias = bias is not None

    # ------------------- fused projection + SE(3) conv kernel -----------------
    def _fused_kernel(*refs):
        if has_bias:
            x_ref, p_ref, w_ref, b_ref, o_ref, proj_ref, stack_ref = refs
        else:
            x_ref, p_ref, w_ref, o_ref, proj_ref, stack_ref = refs

        # SO(3) Chebyshev projection for this (batch, vertex): rows f*K + k.
        pv = p_ref[0]                                              # (K, V) bf16
        for f in range(Fin):                                       # small static unroll
            r = jnp.dot(pv, x_ref[0, f],
                        preferred_element_type=jnp.float32)        # (K, Lp_in) f32
            proj_ref[pl.ds(f * K, K), :] = r.astype(jnp.bfloat16)

        # Stack the S^3 shifted flat-spatial windows so the tap sum becomes the
        # MXU contraction of ONE matmul (Cout, S3*C) @ (S3*C, L_out).
        for t, off in enumerate(tap_offsets):                      # static unroll
            stack_ref[pl.ds(t * C, C), :] = proj_ref[:, pl.ds(off, L_out)]

        res = jnp.dot(w_ref[...], stack_ref[...],
                      preferred_element_type=jnp.float32)          # (Cout, L_out) f32
        if has_bias:
            res = res + b_ref[...]                                 # (Cout, 1) broadcast
        o_ref[0] = res.astype(o_ref.dtype)                         # single store

    in_specs = [
        # per-batch activations: block index constant across v -> VMEM-resident
        pl.BlockSpec((1, Fin, V, Lp_in), lambda b, v: (b, 0, 0, 0)),
        pl.BlockSpec((1, K, V), lambda b, v: (v, 0, 0)),           # per-vertex projector
        pl.BlockSpec((Cout, S3 * C), lambda b, v: (0, 0)),         # weights (resident)
    ]
    args = [x_fl, p_r, w_flat]
    if has_bias:
        in_specs.append(pl.BlockSpec((Cout, 1), lambda b, v: (0, 0)))  # bias (resident)
        args.append(bias.reshape(Cout, 1).astype(jnp.float32))

    # Byte-driven VMEM budget (double-buffered blocks + scratches), with headroom.
    bytes_needed = (2 * Fin * V * Lp_in * 2      # activation block (bf16, x2 buf)
                    + 2 * K * V * 2              # projector block
                    + Cout * S3 * C * 2          # weights
                    + Cout * 4                   # bias
                    + 2 * Cout * L_out * 4       # output block (f32, x2 buf)
                    + C * Lp_in * 2              # projection scratch (bf16)
                    + S3 * C * L_out * 2)        # stacked-window scratch (bf16)
    vmem_limit = int(min(max(2 * bytes_needed, 32 * 1024 * 1024), 64 * 1024 * 1024))

    out = pl.pallas_call(
        _fused_kernel,
        out_shape=jax.ShapeDtypeStruct((B, Cout, V * L_out), jnp.float32),
        grid_spec=pltpu.PrefetchScalarGridSpec(
            num_scalar_prefetch=0,
            grid=(B, V),                       # v innermost: x block re-used across v
            in_specs=in_specs,
            out_specs=pl.BlockSpec((1, Cout, L_out), lambda b, v: (b, 0, v)),
            scratch_shapes=[pltpu.VMEM((C, Lp_in), jnp.bfloat16),
                            pltpu.VMEM((S3 * C, L_out), jnp.bfloat16)],
        ),
        compiler_params=pltpu.CompilerParams(
            dimension_semantics=("parallel", "parallel"),
            vmem_limit_bytes=vmem_limit),
    )(*args)

    # --- glue: drop padded/garbage columns, reshape to module layout ---------
    out = out.reshape(B, Cout, V, L_out)[:, :, :, :X * Yp * Zp]
    out = out.reshape(B, Cout, V, X, Yp, Zp)[:, :, :, :, :Y, :Z]
    return out                                                     # (B, Cout, V, X, Y, Z)


# ---------------------------------------------------------------------------
# Pure-JAX reference of the same math (same bf16 operand rounding).
# ---------------------------------------------------------------------------
def reference_forward(inputs, params):
    projector = params["projector"]
    bias = params["bias"]
    K, S, Cout = params["K"], params["S"], params["Cout"]
    B, Fin, V, X, Y, Z = inputs.shape
    C = Fin * K

    x0 = jnp.transpose(inputs, (2, 1, 0, 3, 4, 5)).reshape(V, Fin * B * X * Y * Z)
    xp = jnp.dot(projector.astype(jnp.bfloat16), x0.astype(jnp.bfloat16),
                 preferred_element_type=jnp.float32)
    xp = xp.reshape(K, V, Fin, B, X, Y, Z).transpose(3, 1, 2, 0, 4, 5, 6)
    xp = xp.reshape(B * V, C, X, Y, Z).astype(jnp.bfloat16)

    weight = _assemble_conv_weight(params, Fin).astype(jnp.bfloat16)
    out = lax.conv_general_dilated(
        xp, weight, window_strides=(1, 1, 1), padding="SAME",
        dimension_numbers=("NCDHW", "OIDHW", "NCDHW"),
        preferred_element_type=jnp.float32)
    if bias is not None:
        out = out + bias[None, :, None, None, None].astype(jnp.float32)
    out = out.reshape(B, V, Cout, X, Y, Z).transpose(0, 2, 1, 3, 4, 5)
    return out


# ---------------------------------------------------------------------------
if __name__ == "__main__":
    # Small deterministic configuration.
    B, Fin, Cout = 2, 2, 3
    V = 12                 # sphere vertices
    K = 3                  # kernel_sizeSph (Chebyshev order + 1)
    S = 3                  # kernel_sizeSpa
    X = Y = Z = 4          # spatial grid

    # Deterministic "Laplacian": cycle-graph Laplacian rescaled to roughly [-1, 1].
    A = np.zeros((V, V), dtype=np.float32)
    for i in range(V):
        A[i, (i + 1) % V] = 1.0
        A[i, (i - 1) % V] = 1.0
    Lm = 2.0 * np.eye(V, dtype=np.float32) - A
    lap = Lm / 2.0 - np.eye(V, dtype=np.float32)

    key = jax.random.PRNGKey(0)
    k_param, k_in = jax.random.split(key)
    params = init_params(lap, Fin, Cout, K, S, k_param, bias=True, isoSpa=True)
    inputs = jax.random.normal(k_in, (B, Fin, V, X, Y, Z), dtype=jnp.float32)

    fwd = jax.jit(lambda x: so3se3_conv_forward(x, params))
    out_pallas = jax.block_until_ready(fwd(inputs))

    out_ref = jax.block_until_ready(reference_forward(inputs, params))

    assert out_pallas.shape == (B, Cout, V, X, Y, Z)
    max_err = float(jnp.max(jnp.abs(out_pallas - out_ref)))
    assert jnp.allclose(out_pallas, out_ref, rtol=2e-2, atol=2e-2), max_err
    print("KERNEL_OK")
</pallas_src>

<mosaic_0001>
module attributes {stable_mosaic.version = 11 : i64} {
  func.func @_fused_kernel(%arg0: i32, %arg1: i32, %arg2: memref<1x2x12x384xbf16, #tpu.memory_space<vmem>>, %arg3: memref<1x3x12xbf16, #tpu.memory_space<vmem>>, %arg4: memref<3x162xbf16, #tpu.memory_space<vmem>>, %arg5: memref<3x1xf32, #tpu.memory_space<vmem>>, %arg6: memref<1x3x256xf32, #tpu.memory_space<vmem>>, %arg7: memref<6x384xbf16, #tpu.memory_space<vmem>>, %arg8: memref<162x256xbf16, #tpu.memory_space<vmem>>) attributes {dimension_semantics = [#tpu.dimension_semantics<parallel>, #tpu.dimension_semantics<parallel>], iteration_bounds = array<i64: 2, 12>, scalar_prefetch = 0 : i64, scratch_operands = 2 : i64, tpu.core_type = #tpu.core_type<tc>, window_params = [{transform_indices = @transform_0, window_bounds = array<i64: 1, 2, 12, 384>}, {transform_indices = @transform_1, window_bounds = array<i64: 1, 3, 12>}, {pipeline_mode = #tpu.pipeline_mode<synchronous>, transform_indices = @transform_2, window_bounds = array<i64: 3, 162>}, {pipeline_mode = #tpu.pipeline_mode<synchronous>, transform_indices = @transform_3, window_bounds = array<i64: 3, 1>}, {transform_indices = @transform_4, window_bounds = array<i64: 1, 3, 256>}]} {
    %c0 = arith.constant 0 : index
    %c0_0 = arith.constant 0 : index
    %c0_1 = arith.constant 0 : index
    %0 = vector.load %arg3[%c0, %c0_0, %c0_1] : memref<1x3x12xbf16, #tpu.memory_space<vmem>>, vector<1x3x12xbf16>
    %1 = vector.shape_cast %0 : vector<1x3x12xbf16> to vector<3x12xbf16>
    %c0_2 = arith.constant 0 : index
    %c0_3 = arith.constant 0 : index
    %c0_4 = arith.constant 0 : index
    %c0_5 = arith.constant 0 : index
    %2 = vector.load %arg2[%c0_2, %c0_3, %c0_4, %c0_5] : memref<1x2x12x384xbf16, #tpu.memory_space<vmem>>, vector<1x1x12x384xbf16>
    %3 = vector.shape_cast %2 : vector<1x1x12x384xbf16> to vector<12x384xbf16>
    %cst = arith.constant dense<0.000000e+00> : vector<3x384xf32>
    %4 = tpu.matmul %1, %3, %cst {dimension_numbers = #tpu.dot_dimension_numbers<[1], [0], [0], [1], [0, 0, 1, 1], [], []>} : vector<3x12xbf16>, vector<12x384xbf16>, vector<3x384xf32> -> vector<3x384xf32>
    %5 = arith.truncf %4 : vector<3x384xf32> to vector<3x384xbf16>
    %c0_6 = arith.constant 0 : index
    %c0_7 = arith.constant 0 : index
    %6 = vector.load %arg7[%c0_6, %c0_7] : memref<6x384xbf16, #tpu.memory_space<vmem>>, vector<3x384xbf16>
    tpu.vector_store %arg7[%c0_6, %c0_7], %5 {strides = array<i32>} : memref<6x384xbf16, #tpu.memory_space<vmem>>, vector<3x384xbf16>,
    %c0_8 = arith.constant 0 : index
    %c1 = arith.constant 1 : index
    %c0_9 = arith.constant 0 : index
    %c0_10 = arith.constant 0 : index
    %7 = vector.load %arg2[%c0_8, %c1, %c0_9, %c0_10] : memref<1x2x12x384xbf16, #tpu.memory_space<vmem>>, vector<1x1x12x384xbf16>
    %8 = vector.shape_cast %7 : vector<1x1x12x384xbf16> to vector<12x384xbf16>
    %cst_11 = arith.constant dense<0.000000e+00> : vector<3x384xf32>
    %9 = tpu.matmul %1, %8, %cst_11 {dimension_numbers = #tpu.dot_dimension_numbers<[1], [0], [0], [1], [0, 0, 1, 1], [], []>} : vector<3x12xbf16>, vector<12x384xbf16>, vector<3x384xf32> -> vector<3x384xf32>
    %10 = arith.truncf %9 : vector<3x384xf32> to vector<3x384xbf16>
    %c3 = arith.constant 3 : index
    %c0_12 = arith.constant 0 : index
    %11 = vector.load %arg7[%c3, %c0_12] : memref<6x384xbf16, #tpu.memory_space<vmem>>, vector<3x384xbf16>
    tpu.vector_store %arg7[%c3, %c0_12], %10 {strides = array<i32>} : memref<6x384xbf16, #tpu.memory_space<vmem>>, vector<3x384xbf16>,
    %c0_13 = arith.constant 0 : index
    %c0_14 = arith.constant 0 : index
    %12 = vector.load %arg7[%c0_13, %c0_14] : memref<6x384xbf16, #tpu.memory_space<vmem>>, vector<6x256xbf16>
    %c0_15 = arith.constant 0 : index
    %c0_16 = arith.constant 0 : index
    %13 = vector.load %arg8[%c0_15, %c0_16] : memref<162x256xbf16, #tpu.memory_space<vmem>>, vector<6x256xbf16>
    tpu.vector_store %arg8[%c0_15, %c0_16], %12 {strides = array<i32>} : memref<162x256xbf16, #tpu.memory_space<vmem>>, vector<6x256xbf16>,
    %c0_17 = arith.constant 0 : index
    %c1_18 = arith.constant 1 : index
    %14 = vector.load %arg7[%c0_17, %c1_18] : memref<6x384xbf16, #tpu.memory_space<vmem>>, vector<6x256xbf16>
    %c6 = arith.constant 6 : index
    %c0_19 = arith.constant 0 : index
    %15 = vector.load %arg8[%c6, %c0_19] : memref<162x256xbf16, #tpu.memory_space<vmem>>, vector<6x256xbf16>
    tpu.vector_store %arg8[%c6, %c0_19], %14 {strides = array<i32>} : memref<162x256xbf16, #tpu.memory_space<vmem>>, vector<6x256xbf16>,
    %c0_20 = arith.constant 0 : index
    %c2 = arith.constant 2 : index
    %16 = vector.load %arg7[%c0_20, %c2] : memref<6x384xbf16, #tpu.memory_space<vmem>>, vector<6x256xbf16>
    %c12 = arith.constant 12 : index
    %c0_21 = arith.constant 0 : index
    %17 = vector.load %arg8[%c12, %c0_21] : memref<162x256xbf16, #tpu.memory_space<vmem>>, vector<6x256xbf16>
    tpu.vector_store %arg8[%c12, %c0_21], %16 {strides = array<i32>} : memref<162x256xbf16, #tpu.memory_space<vmem>>, vector<6x256xbf16>,
    %c0_22 = arith.constant 0 : index
    %c6_23 = arith.constant 6 : index
    %18 = vector.load %arg7[%c0_22, %c6_23] : memref<6x384xbf16, #tpu.memory_space<vmem>>, vector<6x256xbf16>
    %c18 = arith.constant 18 : index
    %c0_24 = arith.constant 0 : index
    %19 = vector.load %arg8[%c18, %c0_24] : memref<162x256xbf16, #tpu.memory_space<vmem>>, vector<6x256xbf16>
    tpu.vector_store %arg8[%c18, %c0_24], %18 {strides = array<i32>} : memref<162x256xbf16, #tpu.memory_space<vmem>>, vector<6x256xbf16>,
    %c0_25 = arith.constant 0 : index
    %c7 = arith.constant 7 : index
    %20 = vector.load %arg7[%c0_25, %c7] : memref<6x384xbf16, #tpu.memory_space<vmem>>, vector<6x256xbf16>
    %c24 = arith.constant 24 : index
    %c0_26 = arith.constant 0 : index
    %21 = vector.load %arg8[%c24, %c0_26] : memref<162x256xbf16, #tpu.memory_space<vmem>>, vector<6x256xbf16>
    tpu.vector_store %arg8[%c24, %c0_26], %20 {strides = array<i32>} : memref<162x256xbf16, #tpu.memory_space<vmem>>, vector<6x256xbf16>,
    %c0_27 = arith.constant 0 : index
    %c8 = arith.constant 8 : index
    %22 = vector.load %arg7[%c0_27, %c8] : memref<6x384xbf16, #tpu.memory_space<vmem>>, vector<6x256xbf16>
    %c30 = arith.constant 30 : index
    %c0_28 = arith.constant 0 : index
    %23 = vector.load %arg8[%c30, %c0_28] : memref<162x256xbf16, #tpu.memory_space<vmem>>, vector<6x256xbf16>
    tpu.vector_store %arg8[%c30, %c0_28], %22 {strides = array<i32>} : memref<162x256xbf16, #tpu.memory_space<vmem>>, vector<6x256xbf16>,
    %c0_29 = arith.constant 0 : index
    %c12_30 = arith.constant 12 : index
    %24 = vector.load %arg7[%c0_29, %c12_30] : memref<6x384xbf16, #tpu.memory_space<vmem>>, vector<6x256xbf16>
    %c36 = arith.constant 36 : index
    %c0_31 = arith.constant 0 : index
    %25 = vector.load %arg8[%c36, %c0_31] : memref<162x256xbf16, #tpu.memory_space<vmem>>, vector<6x256xbf16>
    tpu.vector_store %arg8[%c36, %c0_31], %24 {strides = array<i32>} : memref<162x256xbf16, #tpu.memory_space<vmem>>, vector<6x256xbf16>,
    %c0_32 = arith.constant 0 : index
    %c13 = arith.constant 13 : index
    %26 = vector.load %arg7[%c0_32, %c13] : memref<6x384xbf16, #tpu.memory_space<vmem>>, vector<6x256xbf16>
    %c42 = arith.constant 42 : index
    %c0_33 = arith.constant 0 : index
    %27 = vector.load %arg8[%c42, %c0_33] : memref<162x256xbf16, #tpu.memory_space<vmem>>, vector<6x256xbf16>
    tpu.vector_store %arg8[%c42, %c0_33], %26 {strides = array<i32>} : memref<162x256xbf16, #tpu.memory_space<vmem>>, vector<6x256xbf16>,
    %c0_34 = arith.constant 0 : index
    %c14 = arith.constant 14 : index
    %28 = vector.load %arg7[%c0_34, %c14] : memref<6x384xbf16, #tpu.memory_space<vmem>>, vector<6x256xbf16>
    %c48 = arith.constant 48 : index
    %c0_35 = arith.constant 0 : index
    %29 = vector.load %arg8[%c48, %c0_35] : memref<162x256xbf16, #tpu.memory_space<vmem>>, vector<6x256xbf16>
    tpu.vector_store %arg8[%c48, %c0_35], %28 {strides = array<i32>} : memref<162x256xbf16, #tpu.memory_space<vmem>>, vector<6x256xbf16>,
    %c0_36 = arith.constant 0 : index
    %c36_37 = arith.constant 36 : index
    %30 = vector.load %arg7[%c0_36, %c36_37] : memref<6x384xbf16, #tpu.memory_space<vmem>>, vector<6x256xbf16>
    %c54 = arith.constant 54 : index
    %c0_38 = arith.constant 0 : index
    %31 = vector.load %arg8[%c54, %c0_38] : memref<162x256xbf16, #tpu.memory_space<vmem>>, vector<6x256xbf16>
    tpu.vector_store %arg8[%c54, %c0_38], %30 {strides = array<i32>} : memref<162x256xbf16, #tpu.memory_space<vmem>>, vector<6x256xbf16>,
    %c0_39 = arith.constant 0 : index
    %c37 = arith.constant 37 : index
    %32 = vector.load %arg7[%c0_39, %c37] : memref<6x384xbf16, #tpu.memory_space<vmem>>, vector<6x256xbf16>
    %c60 = arith.constant 60 : index
    %c0_40 = arith.constant 0 : index
    %33 = vector.load %arg8[%c60, %c0_40] : memref<162x256xbf16, #tpu.memory_space<vmem>>, vector<6x256xbf16>
    tpu.vector_store %arg8[%c60, %c0_40], %32 {strides = array<i32>} : memref<162x256xbf16, #tpu.memory_space<vmem>>, vector<6x256xbf16>,
    %c0_41 = arith.constant 0 : index
    %c38 = arith.constant 38 : index
    %34 = vector.load %arg7[%c0_41, %c38] : memref<6x384xbf16, #tpu.memory_space<vmem>>, vector<6x256xbf16>
    %c66 = arith.constant 66 : index
    %c0_42 = arith.constant 0 : index
    %35 = vector.load %arg8[%c66, %c0_42] : memref<162x256xbf16, #tpu.memory_space<vmem>>, vector<6x256xbf16>
    tpu.vector_store %arg8[%c66, %c0_42], %34 {strides = array<i32>} : memref<162x256xbf16, #tpu.memory_space<vmem>>, vector<6x256xbf16>,
    %c0_43 = arith.constant 0 : index
    %c42_44 = arith.constant 42 : index
    %36 = vector.load %arg7[%c0_43, %c42_44] : memref<6x384xbf16, #tpu.memory_space<vmem>>, vector<6x256xbf16>
    %c72 = arith.constant 72 : index
    %c0_45 = arith.constant 0 : index
    %37 = vector.load %arg8[%c72, %c0_45] : memref<162x256xbf16, #tpu.memory_space<vmem>>, vector<6x256xbf16>
    tpu.vector_store %arg8[%c72, %c0_45], %36 {strides = array<i32>} : memref<162x256xbf16, #tpu.memory_space<vmem>>, vector<6x256xbf16>,
    %c0_46 = arith.constant 0 : index
    %c43 = arith.constant 43 : index
    %38 = vector.load %arg7[%c0_46, %c43] : memref<6x384xbf16, #tpu.memory_space<vmem>>, vector<6x256xbf16>
    %c78 = arith.constant 78 : index
    %c0_47 = arith.constant 0 : index
    %39 = vector.load %arg8[%c78, %c0_47] : memref<162x256xbf16, #tpu.memory_space<vmem>>, vector<6x256xbf16>
    tpu.vector_store %arg8[%c78, %c0_47], %38 {strides = array<i32>} : memref<162x256xbf16, #tpu.memory_space<vmem>>, vector<6x256xbf16>,
    %c0_48 = arith.constant 0 : index
    %c44 = arith.constant 44 : index
    %40 = vector.load %arg7[%c0_48, %c44] : memref<6x384xbf16, #tpu.memory_space<vmem>>, vector<6x256xbf16>
    %c84 = arith.constant 84 : index
    %c0_49 = arith.constant 0 : index
    %41 = vector.load %arg8[%c84, %c0_49] : memref<162x256xbf16, #tpu.memory_space<vmem>>, vector<6x256xbf16>
    tpu.vector_store %arg8[%c84, %c0_49], %40 {strides = array<i32>} : memref<162x256xbf16, #tpu.memory_space<vmem>>, vector<6x256xbf16>,
    %c0_50 = arith.constant 0 : index
    %c48_51 = arith.constant 48 : index
    %42 = vector.load %arg7[%c0_50, %c48_51] : memref<6x384xbf16, #tpu.memory_space<vmem>>, vector<6x256xbf16>
    %c90 = arith.constant 90 : index
    %c0_52 = arith.constant 0 : index
    %43 = vector.load %arg8[%c90, %c0_52] : memref<162x256xbf16, #tpu.memory_space<vmem>>, vector<6x256xbf16>
    tpu.vector_store %arg8[%c90, %c0_52], %42 {strides = array<i32>} : memref<162x256xbf16, #tpu.memory_space<vmem>>, vector<6x256xbf16>,
    %c0_53 = arith.constant 0 : index
    %c49 = arith.constant 49 : index
    %44 = vector.load %arg7[%c0_53, %c49] : memref<6x384xbf16, #tpu.memory_space<vmem>>, vector<6x256xbf16>
    %c96 = arith.constant 96 : index
    %c0_54 = arith.constant 0 : index
    %45 = vector.load %arg8[%c96, %c0_54] : memref<162x256xbf16, #tpu.memory_space<vmem>>, vector<6x256xbf16>
    tpu.vector_store %arg8[%c96, %c0_54], %44 {strides = array<i32>} : memref<162x256xbf16, #tpu.memory_space<vmem>>, vector<6x256xbf16>,
    %c0_55 = arith.constant 0 : index
    %c50 = arith.constant 50 : index
    %46 = vector.load %arg7[%c0_55, %c50] : memref<6x384xbf16, #tpu.memory_space<vmem>>, vector<6x256xbf16>
    %c102 = arith.constant 102 : index
    %c0_56 = arith.constant 0 : index
    %47 = vector.load %arg8[%c102, %c0_56] : memref<162x256xbf16, #tpu.memory_space<vmem>>, vector<6x256xbf16>
    tpu.vector_store %arg8[%c102, %c0_56], %46 {strides = array<i32>} : memref<162x256xbf16, #tpu.memory_space<vmem>>, vector<6x256xbf16>,
    %c0_57 = arith.constant 0 : index
    %c72_58 = arith.constant 72 : index
    %48 = vector.load %arg7[%c0_57, %c72_58] : memref<6x384xbf16, #tpu.memory_space<vmem>>, vector<6x256xbf16>
    %c108 = arith.constant 108 : index
    %c0_59 = arith.constant 0 : index
    %49 = vector.load %arg8[%c108, %c0_59] : memref<162x256xbf16, #tpu.memory_space<vmem>>, vector<6x256xbf16>
    tpu.vector_store %arg8[%c108, %c0_59], %48 {strides = array<i32>} : memref<162x256xbf16, #tpu.memory_space<vmem>>, vector<6x256xbf16>,
    %c0_60 = arith.constant 0 : index
    %c73 = arith.constant 73 : index
    %50 = vector.load %arg7[%c0_60, %c73] : memref<6x384xbf16, #tpu.memory_space<vmem>>, vector<6x256xbf16>
    %c114 = arith.constant 114 : index
    %c0_61 = arith.constant 0 : index
    %51 = vector.load %arg8[%c114, %c0_61] : memref<162x256xbf16, #tpu.memory_space<vmem>>, vector<6x256xbf16>
    tpu.vector_store %arg8[%c114, %c0_61], %50 {strides = array<i32>} : memref<162x256xbf16, #tpu.memory_space<vmem>>, vector<6x256xbf16>,
    %c0_62 = arith.constant 0 : index
    %c74 = arith.constant 74 : index
    %52 = vector.load %arg7[%c0_62, %c74] : memref<6x384xbf16, #tpu.memory_space<vmem>>, vector<6x256xbf16>
    %c120 = arith.constant 120 : index
    %c0_63 = arith.constant 0 : index
    %53 = vector.load %arg8[%c120, %c0_63] : memref<162x256xbf16, #tpu.memory_space<vmem>>, vector<6x256xbf16>
    tpu.vector_store %arg8[%c120, %c0_63], %52 {strides = array<i32>} : memref<162x256xbf16, #tpu.memory_space<vmem>>, vector<6x256xbf16>,
    %c0_64 = arith.constant 0 : index
    %c78_65 = arith.constant 78 : index
    %54 = vector.load %arg7[%c0_64, %c78_65] : memref<6x384xbf16, #tpu.memory_space<vmem>>, vector<6x256xbf16>
    %c126 = arith.constant 126 : index
    %c0_66 = arith.constant 0 : index
    %55 = vector.load %arg8[%c126, %c0_66] : memref<162x256xbf16, #tpu.memory_space<vmem>>, vector<6x256xbf16>
    tpu.vector_store %arg8[%c126, %c0_66], %54 {strides = array<i32>} : memref<162x256xbf16, #tpu.memory_space<vmem>>, vector<6x256xbf16>,
    %c0_67 = arith.constant 0 : index
    %c79 = arith.constant 79 : index
    %56 = vector.load %arg7[%c0_67, %c79] : memref<6x384xbf16, #tpu.memory_space<vmem>>, vector<6x256xbf16>
    %c132 = arith.constant 132 : index
    %c0_68 = arith.constant 0 : index
    %57 = vector.load %arg8[%c132, %c0_68] : memref<162x256xbf16, #tpu.memory_space<vmem>>, vector<6x256xbf16>
    tpu.vector_store %arg8[%c132, %c0_68], %56 {strides = array<i32>} : memref<162x256xbf16, #tpu.memory_space<vmem>>, vector<6x256xbf16>,
    %c0_69 = arith.constant 0 : index
    %c80 = arith.constant 80 : index
    %58 = vector.load %arg7[%c0_69, %c80] : memref<6x384xbf16, #tpu.memory_space<vmem>>, vector<6x256xbf16>
    %c138 = arith.constant 138 : index
    %c0_70 = arith.constant 0 : index
    %59 = vector.load %arg8[%c138, %c0_70] : memref<162x256xbf16, #tpu.memory_space<vmem>>, vector<6x256xbf16>
    tpu.vector_store %arg8[%c138, %c0_70], %58 {strides = array<i32>} : memref<162x256xbf16, #tpu.memory_space<vmem>>, vector<6x256xbf16>,
    %c0_71 = arith.constant 0 : index
    %c84_72 = arith.constant 84 : index
    %60 = vector.load %arg7[%c0_71, %c84_72] : memref<6x384xbf16, #tpu.memory_space<vmem>>, vector<6x256xbf16>
    %c144 = arith.constant 144 : index
    %c0_73 = arith.constant 0 : index
    %61 = vector.load %arg8[%c144, %c0_73] : memref<162x256xbf16, #tpu.memory_space<vmem>>, vector<6x256xbf16>
    tpu.vector_store %arg8[%c144, %c0_73], %60 {strides = array<i32>} : memref<162x256xbf16, #tpu.memory_space<vmem>>, vector<6x256xbf16>,
    %c0_74 = arith.constant 0 : index
    %c85 = arith.constant 85 : index
    %62 = vector.load %arg7[%c0_74, %c85] : memref<6x384xbf16, #tpu.memory_space<vmem>>, vector<6x256xbf16>
    %c150 = arith.constant 150 : index
    %c0_75 = arith.constant 0 : index
    %63 = vector.load %arg8[%c150, %c0_75] : memref<162x256xbf16, #tpu.memory_space<vmem>>, vector<6x256xbf16>
    tpu.vector_store %arg8[%c150, %c0_75], %62 {strides = array<i32>} : memref<162x256xbf16, #tpu.memory_space<vmem>>, vector<6x256xbf16>,
    %c0_76 = arith.constant 0 : index
    %c86 = arith.constant 86 : index
    %64 = vector.load %arg7[%c0_76, %c86] : memref<6x384xbf16, #tpu.memory_space<vmem>>, vector<6x256xbf16>
    %c156 = arith.constant 156 : index
    %c0_77 = arith.constant 0 : index
    %65 = vector.load %arg8[%c156, %c0_77] : memref<162x256xbf16, #tpu.memory_space<vmem>>, vector<6x256xbf16>
    tpu.vector_store %arg8[%c156, %c0_77], %64 {strides = array<i32>} : memref<162x256xbf16, #tpu.memory_space<vmem>>, vector<6x256xbf16>,
    %c0_78 = arith.constant 0 : index
    %c0_79 = arith.constant 0 : index
    %66 = vector.load %arg4[%c0_78, %c0_79] : memref<3x162xbf16, #tpu.memory_space<vmem>>, vector<3x162xbf16>
    %c0_80 = arith.constant 0 : index
    %c0_81 = arith.constant 0 : index
    %67 = vector.load %arg8[%c0_80, %c0_81] : memref<162x256xbf16, #tpu.memory_space<vmem>>, vector<162x256xbf16>
    %cst_82 = arith.constant dense<0.000000e+00> : vector<3x256xf32>
    %68 = tpu.matmul %66, %67, %cst_82 {dimension_numbers = #tpu.dot_dimension_numbers<[1], [0], [0], [1], [0, 0, 1, 1], [], []>} : vector<3x162xbf16>, vector<162x256xbf16>, vector<3x256xf32> -> vector<3x256xf32>
    %c0_83 = arith.constant 0 : index
    %c0_84 = arith.constant 0 : index
    %69 = vector.load %arg5[%c0_83, %c0_84] : memref<3x1xf32, #tpu.memory_space<vmem>>, vector<3x1xf32>
    %70 = vector.broadcast %69 : vector<3x1xf32> to vector<3x256xf32>
    %71 = arith.addf %68, %70 : vector<3x256xf32>
    %c0_85 = arith.constant 0 : index
    %c0_86 = arith.constant 0 : index
    %c0_87 = arith.constant 0 : index
    %72 = vector.load %arg6[%c0_85, %c0_86, %c0_87] : memref<1x3x256xf32, #tpu.memory_space<vmem>>, vector<1x3x256xf32>
    %73 = vector.shape_cast %72 : vector<1x3x256xf32> to vector<3x256xf32>
    %74 = vector.shape_cast %71 : vector<3x256xf32> to vector<1x3x256xf32>
    tpu.vector_store %arg6[%c0_85, %c0_86, %c0_87], %74 {strides = array<i32>} : memref<1x3x256xf32, #tpu.memory_space<vmem>>, vector<1x3x256xf32>,
    return
  }
  func.func @transform_0(%arg0: i32, %arg1: i32) -> (i32, i32, i32, i32) {
    %c0_i32 = arith.constant 0 : i32
    %c0_i32_0 = arith.constant 0 : i32
    %c0_i32_1 = arith.constant 0 : i32
    %c0_i32_2 = arith.constant 0 : i32
    return %arg0, %c0_i32, %c0_i32_0, %c0_i32_1 : i32, i32, i32, i32
  }
  func.func @transform_1(%arg0: i32, %arg1: i32) -> (i32, i32, i32) {
    %c0_i32 = arith.constant 0 : i32
    %c0_i32_0 = arith.constant 0 : i32
    %c0_i32_1 = arith.constant 0 : i32
    return %arg1, %c0_i32, %c0_i32_0 : i32, i32, i32
  }
  func.func @transform_2(%arg0: i32, %arg1: i32) -> (i32, i32) {
    %c0_i32 = arith.constant 0 : i32
    %c0_i32_0 = arith.constant 0 : i32
    %c0_i32_1 = arith.constant 0 : i32
    return %c0_i32, %c0_i32_0 : i32, i32
  }
  func.func @transform_3(%arg0: i32, %arg1: i32) -> (i32, i32) {
    %c0_i32 = arith.constant 0 : i32
    %c0_i32_0 = arith.constant 0 : i32
    %c0_i32_1 = arith.constant 0 : i32
    return %c0_i32, %c0_i32_0 : i32, i32
  }
  func.func @transform_4(%arg0: i32, %arg1: i32) -> (i32, i32, i32) {
    %c0_i32 = arith.constant 0 : i32
    %c0_i32_0 = arith.constant 0 : i32
    return %arg0, %c0_i32, %arg1 : i32, i32, i32
  }
}

</mosaic_0001>

<bundles_post_ra>
// kernel: _lambda_.1
= control target key start
LH: loop header
LB: loop body
LE: loop exit
PB: predicated region body
PF: predicated region fallthrough
CT: control target
= control target key end

     0   :  { %s1698_s15 = smov 0   ;;  %s1700_s16 = smov 0   ;;  %s2104_s0 = inlined_call_operand.vmem [shape: bf16[2,2,12,384], index: 0, kind: input, shape index: {}]   ;;  %s2105_s1 = inlined_call_operand.vmem [shape: bf16[12,3,12], index: 1, kind: input, shape index: {}]   ;;  %s2106_s2 = inlined_call_operand.vmem [shape: bf16[3,162], index: 2, kind: input, shape index: {}]   ;;  %s2107_s3 = inlined_call_operand.vmem [shape: f32[3,1], index: 3, kind: input, shape index: {}]   ;;  %s2108_s4 = inlined_call_operand.vmem [shape: f32[2,3,3072], index: 4, kind: output, shape index: {}]  }
   0x1   :  { %s1702_s17 = smov 0   ;;  %s1704_s18 = smov 0  }
   0x2   :  { %s1706_s19 = smov 0  }
   0x3 LB: > { %s23_s20 = sadd.s32 1, %s1634_s17  ;;  %s26_s21 = sadd.s32 1, %s1638_s18  ;;  %s1642_s19 = sphi %s1706_s19, %s14_s19   ;;  %s1638_s18 = sphi %s1704_s18, %s2114_s18   ;;  %s1634_s17 = sphi %s1702_s17, %s2113_s17   ;;  %s1630_s16 = sphi %s1700_s16, %s2112_s16   ;;  %s1626_s15 = sphi %s1698_s15, %s2111_s15  }
   0x4   : > { %p24_p0 = scmp.ge.s32.totalorder %s23_s20, 12  ;;  %p1429_p1 = scmp.ge.s32.totalorder %s1642_s19, 1 }
   0x5   : > { %p185_p2 = scmp.lt.s32.totalorder %s1642_s19, 25 }
   0x6   : > { %s2116_s20 = smov (%p24_p0, %s23_s20), 0  ;;  %s2118_s21 = smov (!%p24_p0, %s26_s21), %s1638_s18 }
   0x7   : > { %p186_p3 = pnand %p1429_p1, %p185_p2  ;;  %p28_p4 = scmp.ge.s32.totalorder %s2118_s21, 2 }
   0x8   : > { %p219_p5 = scmp.lt.s32.totalorder (!%p186_p3), %s1630_s16, 1  ;;  %p224_p6 = scmp.lt.s32.totalorder (!%p186_p3), %s1626_s15, 11 }
   0x9   : > { %s2120_s21 = smov (%p28_p4, %s2118_s21), 0  ;;  %189 = sbr.rel (%p186_p3) target bundleno = 742 (0x2e6), region = 36 }
   0xa   : > { %s1647_s5 = smov (!%p186_p3), 54   ;;  %s1648_s6 = smov (!%p186_p3), 55  }
   0xb   : > { %s1649_s7 = smov (!%p186_p3), 79   ;;  %s1650_s8 = smov (!%p186_p3), 86  }
   0xc   : > { %s1651_s9 = smov (!%p186_p3), 114   ;;  %s1652_s10 = smov (!%p186_p3), 121  }
   0xd   : > { %s1653_s11 = smov (!%p186_p3), 50   ;;  %s1654_s12 = smov (!%p186_p3), 78  }
   0xe   : > { %v1644_v0 = vmov 0   ;;  %s2122_s16 = smov (!%p219_p5, %s1630_s16), 1  ;;  %vm261_vm0 = vcmask 1045504   ;;  %vm257_vm1 = vcmask 97280   ;;  %v1645_v6 = vmov 0.0   ;;  %s1655_s13 = smov 56  }
   0xf   : > { %303 = vmatprep.mubr.bf16.mxu1 %v1644_v0  ;;  %1572 = vset.pattern.permute.xlu0 %v1644_v0  ;;  %s225_s22 = scalar_select %p224_p6, %s1626_s15, 11  ;;  %vm1646_vm2 = vmmov 0   ;;  %vm365_vm3 = vcmask 1041408   ;;  %vm366_vm4 = vsmask.f32 1280  ;;  %vm368_vm5 = vcmask 1045508  }
  0x10   : > { %s1501_s23 = smul.u32 48, %s2122_s16  ;;  %vm369_vm6 = vsmask.f32 5376  ;;  %vm367_vm7 = vmand %vm365_vm3, %vm366_vm4  ;;  %v372_v15 = vld [vmem:[#allocation2] sm:$0x33]  ;;  %vm515_vm10 = vcmask 1042433  }
  0x11   : > { %s1431_s24 = sshll.u32 %s225_s22, 1  ;;  %vm370_vm8 = vmand %vm368_vm5, %vm369_vm6  ;;  %v375_v21 = vld [vmem:[#allocation2 + $0x8] sm:$0x3]  ;;  %vm516_vm11 = vsmask.f32 7942  ;;  %vm518_vm12 = vcmask 1046533  }
  0x12   : > { %s223_s27 = scalar_lea.vmem %s2104_s0, %s1501_s23  ;;  %s227_s30 = scalar_lea.vmem %s2105_s1, %s1431_s24  ;;  %vm371_vm9 = vmor %vm370_vm8, %vm367_vm7  ;;  %vm519_vm13 = vsmask.f32 7958  ;;  %vm887_vm3 = vcmask 646144   ;;  %vm797_vm4 = vcmask 703488   ;;  %vm707_vm5 = vcmask 932864  }
  0x13   : > { %v1573_v1 = vld [vmem:[%s223_s27 + $0x4] ss:$12 sps:$4 sm:$0x3f]   ;;  %v1575_v2 = vld [vmem:[%s223_s27] ss:$12 sps:$4 sm:$0x3f]   ;;  %vm1751_vm14 = vmand %vm515_vm10, %vm516_vm11 }
  0x14   : > { %1437 = vmatprep.subr.msk.bf16.mxu1 %vm261_vm0, %v1573_v1  ;;  %v263_v3 = vsel %vm261_vm0, %v1575_v2, 0  ;;  %v1576_v4 = vld [vmem:[%s223_s27 + $0x8] ss:$12 sps:$4 sm:$0x3f]   ;;  %v239_v5 = vld [vmem:[%s227_s30] sm:$0x3]  ;;  %vm520_vm15 = vmand %vm518_vm12, %vm519_vm13 }
  0x15   : > { %286 = vmatpush1.bf16.msra.mxu1 %v263_v3  ;;  %v269_v7 = vsel %vm261_vm0, %v1576_v4, 0  ;;  %v1577_v8 = vld [vmem:[%s223_s27 + $0x1c] ss:$12 sps:$4 sm:$0x3f]   ;;  %s1656_s14 = smov 84   ;;  %s1657_s22 = smov 80  }
  0x16   : > { %1489 = vmatprep.subr.bf16.mxu1 %v1645_v6  ;;  %v1579_v9 = vld [vmem:[%s223_s27 + $0x18] ss:$12 sps:$4 sm:$0x3f]   ;;  %v1580_v11 = vld [vmem:[%s223_s27 + $0x20] ss:$12 sps:$4 sm:$0x3f]  }
  0x17   : > { %v397_v10 = vsel %vm261_vm0, %v1579_v9, 0  ;;  %v403_v12 = vsel %vm261_vm0, %v1580_v11, 0  ;;  %s1658_s23 = smov 90   ;;  %s1659_s24 = smov 85   ;;  %vm617_vm6 = vcmask 990208   ;;  %vm1002_vm8 = vcmask 408576  }
  0x18   : > { %1438 = vmatmul.mubr.msk.bf16.vlgmr.msra.gmra.mxu1 %vm257_vm1, %v239_v5  ;;  %s1660_s25 = smov 92   ;;  %s1661_s26 = smov 91   ;;  %vm941_vm10 = vcmask 457728   ;;  %vm851_vm11 = vcmask 687104   ;;  %vm1272_vm12 = vcmask 277504   ;;  %vm872_vm13 = vcmask 654336  }
  0x19   : > { %1490 = vmatpush3.bf16.msra.mxu1 %v269_v7  ;;  %1491 = vmatprep.mubr.msk.bf16.mxu1 %vm1646_vm2, %v1645_v6  ;;  %s1662_s27 = smov 116   ;;  %s1663_s28 = smov 115  }
  0x1a   : > { %1449 = vmatprep.subr.msk.bf16.mxu1 %vm261_vm0, %v1577_v8  ;;  %vm521_vm0 = vmor %vm520_vm15, %vm1751_vm14  ;;  %s1664_s29 = smov 122   ;;  %s1665_s30 = smov 120   ;;  %vm822_vm15 = vcmask 695296  }
  0x20   : > { %1492 = vmatmul.mubr.msk.bf16.vlgmr.msra.gmra.mxu1 %vm257_vm1, %v239_v5 }
  0x21   : > { %420 = vmatpush1.bf16.msra.mxu1 %v397_v10  ;;  %437 = vmatprep.mubr.bf16.mxu1 %v1644_v0 }
  0x22   : > { %1495 = vmatprep.subr.bf16.mxu1 %v1645_v6 }
  0x28   : > { %1450 = vmatmul.mubr.msk.bf16.vlgmr.msra.gmra.mxu1 %vm257_vm1, %v239_v5 }
  0x29   : > { %1496 = vmatpush3.bf16.msra.mxu1 %v403_v12  ;;  %1497 = vmatprep.mubr.msk.bf16.mxu1 %vm1646_vm2, %v1645_v6  ;;  %vm977_vm2 = vcmask 441344  }
  0x30   : > { %1498 = vmatmul.mubr.msk.bf16.vlgmr.msra.gmra.mxu1 %vm257_vm1, %v239_v5  ;;  %vm550_vm1 = vcmask 1043456  }
  0xd8   : > { %v305_v13 = vpop.f32.mrf.mxu1 }
  0xda   : > { %v307_v14 = vpop.f32.mrf.mxu1 }
  0xdb   : > { %v1481_v16 = vpack.c.bf16 %v307_v14, %v305_v13 }
  0xdc   : > { %v309_v17 = vpop.f32.mrf.mxu1 }
  0xdd   : > { %v373_v18 = vsel %vm371_vm9, %v1481_v16, %v372_v15  ;;  %vm912_vm9 = vcmask 637952  }
  0xde   : > { %374 = vst [vmem:[#allocation2] sm:$0x33] %v373_v18  ;;  %v310_v19 = vpop.f32.mrf.mxu1 }
  0xe0   : > { %v346_v20 = vpop.f32.mrf.mxu1 }
  0xe1   : > { %v1482_v22 = vpack.c.bf16 %v346_v20, %v346_v20 }
  0xe2   : > { %v1493_v23 = vpop.f32.mrf.mxu1 }
  0xe3   : > { %v376_v24 = vsel %vm367_vm7, %v1482_v22, %v375_v21  ;;  %vm962_vm7 = vcmask 449536  }
  0xe4   : > { %377 = vst [vmem:[#allocation2 + $0x8] sm:$0x3] %v376_v24  ;;  %v349_v25 = vpop.f32.mrf.mxu1 }
  0xe5   : > { %v522_v40 = vld [vmem:[#allocation2] sm:$0x66] }
  0xe6   : > { %v1494_v26 = vpop.f32.mrf.mxu1 }
  0xe8   : > { %v439_v27 = vpop.f32.mrf.mxu1 }
  0xea   : > { %v441_v28 = vpop.f32.mrf.mxu1 }
  0xeb   : > { %v1483_v29 = vpack.c.bf16 %v441_v28, %v439_v27  ;;  %v525_v50 = vld [vmem:[#allocation2 + $0x8] sm:$0x6] }
  0xec   : > { %v443_v31 = vpop.f32.mrf.mxu1 }
  0xed   : > { %v498_v32 = vshrl.u32 %v1483_v29, 16  ;;  %v501_v33 = vshll.u32 %v1483_v29, 16 }
  0xee   : > { %v444_v34 = vpop.f32.mrf.mxu1 }
  0xef   : > { %v500_v35 = vrot.slane %v498_v32, 6  ;;  %v503_v36 = vrot.slane %v501_v33, 7 }
  0xf0   : > { %v480_v37 = vpop.f32.mrf.mxu1 }
  0xf1   : > { %v504_v38 = vor.u32 %v503_v36, %v500_v35  ;;  %v1484_v39 = vpack.c.bf16 %v480_v37, %v480_v37 }
  0xf2   : > { %v1499_v41 = vpop.f32.mrf.mxu1 }
  0xf3   : > { %v523_v42 = vsel %vm521_vm0, %v504_v38, %v522_v40  ;;  %v506_v43 = vshrl.u32 %v1484_v39, 16  ;;  %v509_v44 = vshll.u32 %v1484_v39, 16  ;;  %vm732_vm0 = vcmask 752640  }
  0xf4   : > { %524 = vst [vmem:[#allocation2] sm:$0x66] %v523_v42  ;;  %v483_v45 = vpop.f32.mrf.mxu1 }
  0xf5   : > { %v508_v46 = vrot.slane %v506_v43, 6  ;;  %v511_v47 = vrot.slane %v509_v44, 7 }
  0xf6   : > { %v1500_v48 = vpop.f32.mrf.mxu1 }
  0xf7   : > { %v512_v49 = vor.u32 %v511_v47, %v508_v46 }
  0xf9   : > { %v526_v51 = vsel %vm1751_vm14, %v512_v49, %v525_v50  ;;  %vm782_vm14 = vcmask 736256  }
  0xfa   : > { %527 = vst [vmem:[#allocation2 + $0x8] sm:$0x6] %v526_v51 }
  0xfb   : > { %v966_v52 = vld [vmem:[#allocation2] sm:$0x77] }
  0xfc   : > { %v949_v53 = vld [vmem:[#allocation2] sm:$0x77]  ;;  %970 = vrot.lane.b32.xlu0 %v966_v52, %s1647_s5 }
  0xfd   : > { %v953_v54 = vrot.slane %v949_v53, 7  ;;  %v876_v55 = vld [vmem:[#allocation2] sm:$0x77] }
  0xfe   : > { %v786_v57 = vld [vmem:[#allocation2] sm:$0x77] }
  0xff   : > { %955 = vrot.lane.b32.xlu1 %v953_v54, %s1648_s6  ;;  %v696_v59 = vld [vmem:[#allocation2] sm:$0x77] }
 0x100   : > { %880 = vrot.lane.b32.xlu0 %v876_v55, %s1649_s7  ;;  %v606_v61 = vld [vmem:[#allocation2] sm:$0x77] }
 0x101   : > { %v967_v56 = vld [vmem:[#allocation2 + $0x8] sm:$0x7]  ;;  %v1760_v62 = vld [vmem:[#allocation2] sm:$0x77] }
 0x102   : > { %v877_v58 = vld [vmem:[#allocation2 + $0x8] sm:$0x7]  ;;  %v985_v0 = vrot.slane %v1760_v62, 5  ;;  %v1763_v1 = vld [vmem:[#allocation2] sm:$0x77] }
 0x103   : > { %972 = vrot.lane.b32.xlu1 %v967_v56, %s1647_s5  ;;  %v787_v60 = vld [vmem:[#allocation2 + $0x8] sm:$0x7]  ;;  %v895_v4 = vrot.slane %v1763_v1, 5  ;;  %v1769_v5 = vld [vmem:[#allocation2] sm:$0x77]  ;;  %s1666_s5 = smov 127  }
 0x104   : > { %790 = vrot.lane.b32.xlu0 %v786_v57, %s1650_s8  ;;  %v697_v63 = vld [vmem:[#allocation2 + $0x8] sm:$0x7]  ;;  %v924_v8 = vrot.slane %v1769_v5, 6  ;;  %v1778_v9 = vld [vmem:[#allocation2] sm:$0x77] }
 0x105   : > { %v607_v2 = vld [vmem:[#allocation2 + $0x8] sm:$0x7]  ;;  %v528_v11 = vld [vmem:[#allocation2] sm:$0x77]  ;;  %v834_v13 = vrot.slane %v1778_v9, 6 }
 0x106   : > { %v950_v3 = vld [vmem:[#allocation2 + $0x8] sm:$0x7]  ;;  %529 = vst [vmem:[#allocation3] sm:$0x77] %v528_v11  ;;  %v859_v14 = vld [vmem:[#allocation2] sm:$0x77] }
 0x107   : > { %882 = vrot.lane.b32.xlu1 %v877_v58, %s1649_s7  ;;  %v954_v6 = vrot.slane %v950_v3, 7  ;;  %v1774_v7 = vld [vmem:[#allocation2 + $0x8] sm:$0x7]  ;;  %v863_v17 = vrot.slane %v859_v14, 7  ;;  %v769_v18 = vld [vmem:[#allocation2] sm:$0x77] }
 0x108   : > { %700 = vrot.lane.b32.xlu0 %v696_v59, %s1651_s9  ;;  %v986_v10 = vrot.slane %v1774_v7, 5  ;;  %v1784_v12 = vld [vmem:[#allocation2 + $0x8] sm:$0x7]  ;;  %v773_v21 = vrot.slane %v769_v18, 7  ;;  %v1805_v22 = vld [vmem:[#allocation2] sm:$0x77] }
 0x109   : > { %v896_v15 = vrot.slane %v1784_v12, 5  ;;  %v1794_v16 = vld [vmem:[#allocation2 + $0x8] sm:$0x7]  ;;  %v805_v25 = vrot.slane %v1805_v22, 5  ;;  %v1812_v26 = vld [vmem:[#allocation2] sm:$0x77] }
 0x10a   : > { %v925_v19 = vrot.slane %v1794_v16, 6  ;;  %v1800_v20 = vld [vmem:[#allocation2 + $0x8] sm:$0x7]  ;;  %v715_v29 = vrot.slane %v1812_v26, 5  ;;  %v1818_v30 = vld [vmem:[#allocation2] sm:$0x77] }
 0x10b   : > { %792 = vrot.lane.b32.xlu1 %v787_v60, %s1650_s8  ;;  %v835_v23 = vrot.slane %v1800_v20, 6  ;;  %v860_v24 = vld [vmem:[#allocation2 + $0x8] sm:$0x7]  ;;  %v744_v33 = vrot.slane %v1818_v30, 6  ;;  %v1826_v34 = vld [vmem:[#allocation2] sm:$0x77] }
 0x10c   : > { %610 = vrot.lane.b32.xlu0 %v606_v61, %s1652_s10  ;;  %v864_v27 = vrot.slane %v860_v24, 7  ;;  %v770_v28 = vld [vmem:[#allocation2 + $0x8] sm:$0x7]  ;;  %v654_v37 = vrot.slane %v1826_v34, 6  ;;  %v679_v38 = vld [vmem:[#allocation2] sm:$0x77] }
 0x10d   : > { %v774_v31 = vrot.slane %v770_v28, 7  ;;  %v1823_v32 = vld [vmem:[#allocation2 + $0x8] sm:$0x7]  ;;  %v683_v41 = vrot.slane %v679_v38, 7  ;;  %v589_v42 = vld [vmem:[#allocation2] sm:$0x77] }
 0x10e   : > { %v806_v35 = vrot.slane %v1823_v32, 5  ;;  %v1830_v36 = vld [vmem:[#allocation2 + $0x8] sm:$0x7]  ;;  %v593_v45 = vrot.slane %v589_v42, 7  ;;  %v621_v46 = vld [vmem:[#allocation2] sm:$0x77] }
 0x10f   : > { %702 = vrot.lane.b32.xlu1 %v697_v63, %s1651_s9  ;;  %v716_v39 = vrot.slane %v1830_v36, 5  ;;  %v1840_v40 = vld [vmem:[#allocation2 + $0x8] sm:$0x7]  ;;  %v625_v49 = vrot.slane %v621_v46, 5  ;;  %v530_v50 = vld [vmem:[#allocation2] sm:$0x77] }
 0x110   : > { %989 = vrot.lane.b32.xlu0 %v985_v0, %s1653_s11  ;;  %v745_v43 = vrot.slane %v1840_v40, 6  ;;  %v1846_v44 = vld [vmem:[#allocation2 + $0x8] sm:$0x7]  ;;  %v534_v53 = vrot.slane %v530_v50, 5  ;;  %v926_v56 = vrot.slane %v924_v8, 4  ;;  %v897_v59 = vrot.slane %v895_v4, 4 }
 0x111   : > { %v655_v47 = vrot.slane %v1846_v44, 6  ;;  %v680_v48 = vld [vmem:[#allocation2 + $0x8] sm:$0x7]  ;;  %v807_v63 = vrot.slane %v805_v25, 4  ;;  %v836_v1 = vrot.slane %v834_v13, 4  ;;  %s1668_s7 = smov 44  }
 0x112   : > { %v684_v51 = vrot.slane %v680_v48, 7  ;;  %v590_v52 = vld [vmem:[#allocation2 + $0x8] sm:$0x7]  ;;  %v746_v5 = vrot.slane %v744_v33, 4  ;;  %s1669_s8 = smov 43   ;;  %v717_v9 = vrot.slane %v715_v29, 4 }
 0x113   : > { %612 = vrot.lane.b32.xlu1 %v607_v2, %s1652_s10  ;;  %v594_v54 = vrot.slane %v590_v52, 7  ;;  %v1857_v55 = vld [vmem:[#allocation2 + $0x8] sm:$0x7]  ;;  %s1670_s9 = smov 42   ;;  %v627_v14 = vrot.slane %v625_v49, 4  ;;  %s1671_s10 = smov 49  }
 0x114   : > { %899 = vrot.lane.b32.xlu0 %v895_v4, %s1654_s12  ;;  %v626_v57 = vrot.slane %v1857_v55, 5  ;;  %v1863_v58 = vld [vmem:[#allocation2 + $0x8] sm:$0x7]  ;;  %v898_v24 = vrot.slane %v896_v15, 4  ;;  %v808_v26 = vrot.slane %v806_v35, 4  ;;  %v837_v28 = vrot.slane %v835_v23, 4 }
 0x115   : > { %v535_v60 = vrot.slane %v1863_v58, 5  ;;  %v1872_v61 = vld [vmem:[#allocation2 + $0x8] sm:$0x7]  ;;  %v927_v12 = vrot.slane %v925_v19, 4  ;;  %v718_v16 = vrot.slane %v716_v39, 4  ;;  %v657_v50 = vrot.slane %v655_v47, 4 }
 0x116   : > { %v565_v2 = vrot.slane %v1872_v61, 6  ;;  %v1057_v3 = vld [vmem:[#allocation2 + $0x8] sm:$0x7]  ;;  %v1071_v46 = vld [vmem:[#allocation2] sm:$0x77] }
 0x117   : > { %957 = vrot.lane.b32.xlu1 %v954_v6, %s1648_s6  ;;  %s1667_s6 = smov 126   ;;  %v1887_v4 = vld [vmem:[#allocation2 + $0x8] sm:$0x7] }
 0x118   : > { %928 = vrot.lane.b32.xlu0 %v924_v8, %s1655_s13  ;;  %v1076_v6 = vrot.slane %v1887_v4, 5  ;;  %v1892_v8 = vld [vmem:[#allocation2 + $0x8] sm:$0x7] }
 0x119   : > { %v1105_v11 = vrot.slane %v1892_v8, 6 }
 0x11b   : > { %991 = vrot.lane.b32.xlu1 %v986_v10, %s1653_s11 }
 0x11c   : > { %838 = vrot.lane.b32.xlu0 %v834_v13, %s1656_s14  ;;  %v1901_v13 = vld [vmem:[#allocation2 + $0x8] sm:$0x7] }
 0x11d   : > { %v1015_v18 = vrot.slane %v1901_v13, 6 }
 0x11f   : > { %901 = vrot.lane.b32.xlu1 %v896_v15, %s1654_s12  ;;  %v1927_v15 = vld [vmem:[#allocation2] sm:$0x77]  ;;  %v1017_v7 = vrot.slane %v1015_v18, 4 }
 0x120   : > { %865 = vrot.lane.b32.xlu0 %v863_v17, %s1657_s22  ;;  %v560_v17 = vld [vmem:[#allocation2] sm:$0x77]  ;;  %v1104_v20 = vrot.slane %v1927_v15, 6 }
 0x121   : > { %v564_v22 = vrot.slane %v560_v17, 6 }
 0x123   : > { %930 = vrot.lane.b32.xlu1 %v925_v19, %s1655_s13 }
 0x124   : > { %775 = vrot.lane.b32.xlu0 %v773_v21, %s1658_s23  ;;  %v656_v21 = vrot.slane %v654_v37, 4 }
 0x127   : > { %840 = vrot.lane.b32.xlu1 %v835_v23, %s1656_s14 }
 0x128   : > { %809 = vrot.lane.b32.xlu0 %v805_v25, %s1659_s24  ;;  %v566_v25 = vrot.slane %v564_v22, 4 }
 0x12b   : > { %867 = vrot.lane.b32.xlu1 %v864_v27, %s1657_s22  ;;  %v536_v27 = vrot.slane %v534_v53, 4 }
 0x12c   : > { %719 = vrot.lane.b32.xlu0 %v715_v29, %s1660_s25 }
 0x12f   : > { %777 = vrot.lane.b32.xlu1 %v774_v31, %s1658_s23  ;;  %v747_v31 = vrot.slane %v745_v43, 4  ;;  %s1432_s23 = sshll.u32 %s1626_s15, 1 }
 0x130   : > { %748 = vrot.lane.b32.xlu0 %v744_v33, %s1661_s26  ;;  %p231_p7 = scmp.lt.s32.totalorder %s1432_s23, 23 }
 0x132   : > { %s2124_s23 = smov (!%p231_p7, %s1432_s23), 23 }
 0x133   : > { %811 = vrot.lane.b32.xlu1 %v806_v35, %s1659_s24  ;;  %v1106_v35 = vrot.slane %v1104_v20, 4 }
 0x134   : > { %658 = vrot.lane.b32.xlu0 %v654_v37, %s1662_s27 }
 0x137   : > { %721 = vrot.lane.b32.xlu1 %v716_v39, %s1660_s25 }
 0x138   : > { %685 = vrot.lane.b32.xlu0 %v683_v41, %s1663_s28  ;;  %v628_v41 = vrot.slane %v626_v57, 4 }
 0x13b   : > { %750 = vrot.lane.b32.xlu1 %v745_v43, %s1661_s26 }
 0x13c   : > { %595 = vrot.lane.b32.xlu0 %v593_v45, %s1664_s29  ;;  %v1056_v45 = vld [vmem:[#allocation2] sm:$0x77] }
 0x13f   : > { %660 = vrot.lane.b32.xlu1 %v655_v47, %s1662_s27 }
 0x140   : > { %629 = vrot.lane.b32.xlu0 %v625_v49, %s1665_s30 }
 0x143   : > { %687 = vrot.lane.b32.xlu1 %v684_v51, %s1663_s28 }
 0x144   : > { %538 = vrot.lane.b32.xlu0 %v534_v53, %s1666_s5 }
 0x147   : > { %597 = vrot.lane.b32.xlu1 %v594_v54, %s1664_s29  ;;  %v1075_v54 = vrot.slane %v1071_v46, 5 }
 0x148   : > { %932 = vrot.lane.b32.xlu0 %v926_v56, %s1655_s13 }
 0x14b   : > { %631 = vrot.lane.b32.xlu1 %v626_v57, %s1665_s30 }
 0x14c   : > { %903 = vrot.lane.b32.xlu0 %v897_v59, %s1654_s12  ;;  %v567_v59 = vrot.slane %v565_v2, 4 }
 0x14f   : > { %540 = vrot.lane.b32.xlu1 %v535_v60, %s1666_s5 }
 0x150   : > { %813 = vrot.lane.b32.xlu0 %v807_v63, %s1659_s24 }
 0x153   : > { %570 = vrot.lane.b32.xlu1 %v565_v2, %s1667_s6 }
 0x154   : > { %842 = vrot.lane.b32.xlu0 %v836_v1, %s1656_s14  ;;  %v1077_v1 = vrot.slane %v1075_v54, 4 }
 0x157   : > { %1062 = vrot.lane.b32.xlu1 %v1057_v3, %s1668_s7 }
 0x158   : > { %752 = vrot.lane.b32.xlu0 %v746_v5, %s1661_s26 }
 0x15b   : > { %1081 = vrot.lane.b32.xlu1 %v1076_v6, %s1669_s8 }
 0x15c   : > { %723 = vrot.lane.b32.xlu0 %v717_v9, %s1660_s25 }
 0x15f   : > { %1110 = vrot.lane.b32.xlu1 %v1105_v11, %s1670_s9 }
 0x160   : > { %633 = vrot.lane.b32.xlu0 %v627_v14, %s1665_s30  ;;  %v537_v14 = vrot.slane %v535_v60, 4 }
 0x163   : > { %1020 = vrot.lane.b32.xlu1 %v1015_v18, %s1671_s10 }
 0x164   : > { %662 = vrot.lane.b32.xlu0 %v656_v21, %s1662_s27 }
 0x167   : > { %905 = vrot.lane.b32.xlu1 %v898_v24, %s1654_s12 }
 0x168   : > { %572 = vrot.lane.b32.xlu0 %v566_v25, %s1667_s6  ;;  %v1107_v25 = vrot.slane %v1105_v11, 4  ;;  %v1078_v11 = vrot.slane %v1076_v6, 4 }
 0x16b   : > { %815 = vrot.lane.b32.xlu1 %v808_v26, %s1659_s24  ;;  %s1502_s24 = smul.u32 24, %s2122_s16 }
 0x16c   : > { %542 = vrot.lane.b32.xlu0 %v536_v27, %s1666_s5  ;;  %v987_v27 = vrot.slane %v985_v0, 4 }
 0x16e   : > { %v971_v29 = vpop.permute.xlu0 %970 }
 0x16f   : > { %844 = vrot.lane.b32.xlu1 %v837_v28, %s1656_s14  ;;  %v974_v19 = vrot.slane %v971_v29, 4 }
 0x170   : > { %934 = vrot.lane.b32.xlu0 %v927_v12, %s1655_s13 }
 0x171   : > { %v1929_v30 = vpop.permute.xlu1 %955 }
 0x172   : > { %v881_v32 = vpop.permute.xlu0 %880  ;;  %v959_v26 = vrot.slane %v1929_v30, 4 }
 0x173   : > { %754 = vrot.lane.b32.xlu1 %v747_v31, %s1661_s26  ;;  %v884_v42 = vrot.slane %v881_v32, 4 }
 0x174   : > { %568 = vrot.lane.b32.xlu0 %v564_v22, %s1667_s6 }
 0x175   : > { %v973_v23 = vpop.permute.xlu1 %972 }
 0x176   : > { %v975_v33 = vrot.slane %v973_v23, 4  ;;  %v791_v34 = vpop.permute.xlu0 %790  ;;  %v988_v23 = vrot.slane %v986_v10, 4 }
 0x177   : > { %725 = vrot.lane.b32.xlu1 %v718_v16, %s1660_s25  ;;  %v794_v51 = vrot.slane %v791_v34, 4  ;;  %s234_s25 = sadd.s32 %s1502_s24, %s2124_s23 }
 0x178   : > { %v976_v37 = vsel %vm550_vm1, %v974_v19, %v975_v33  ;;  %1112 = vrot.lane.b32.xlu0 %v1106_v35, %s1670_s9  ;;  %s1433_s26 = sshll.u32 %s234_s25, 2 }
 0x179   : > { %v978_v38 = vsel %vm977_vm2, %v971_v29, %v976_v37  ;;  %v883_v40 = vpop.permute.xlu1 %882  ;;  %v1010_v29 = vld [vmem:[#allocation2] sm:$0x77]  ;;  %vm761_vm2 = vcmask 744448   ;;  %s236_s29 = scalar_lea.vmem %s2108_s4, %s1433_s26 }
 0x17a   : > { %980 = vst [vmem:[#allocation3 + $0x58] sm:$0x77] %v978_v38  ;;  %v885_v36 = vrot.slane %v883_v40, 4  ;;  %v701_v39 = vpop.permute.xlu0 %700  ;;  %v1014_v62 = vrot.slane %v1010_v29, 6  ;;  %v1040_v40 = vld [vmem:[#allocation2 + $0x8] sm:$0x7] }
 0x17b   : > { %635 = vrot.lane.b32.xlu1 %v628_v41, %s1665_s30  ;;  %v704_v63 = vrot.slane %v701_v39, 4 }
 0x17c   : > { %v886_v43 = vsel %vm550_vm1, %v884_v42, %v885_v36  ;;  %1060 = vrot.lane.b32.xlu0 %v1056_v45, %s1668_s7  ;;  %v1016_v19 = vrot.slane %v1014_v62, 4  ;;  %v1044_v45 = vrot.slane %v1040_v40, 7 }
 0x17d   : > { %v888_v48 = vsel %vm887_vm3, %v881_v32, %v886_v43  ;;  %v793_v49 = vpop.permute.xlu1 %792  ;;  %vm671_vm3 = vcmask 949248  }
 0x17e   : > { %890 = vst [vmem:[#allocation3 + $0x60] sm:$0x77] %v888_v48  ;;  %v795_v52 = vrot.slane %v793_v49, 4  ;;  %v611_v53 = vpop.permute.xlu0 %610 }
 0x17f   : > { %664 = vrot.lane.b32.xlu1 %v657_v50, %s1662_s27  ;;  %v614_v17 = vrot.slane %v611_v53, 4  ;;  %v1992_v49 = vld.sshfl [vmem:[%s2106_s2] sm:$0x33 pattern:$0x76325410] }
 0x180   : > { %v796_v55 = vsel %vm550_vm1, %v794_v51, %v795_v52  ;;  %1079 = vrot.lane.b32.xlu0 %v1075_v54, %s1669_s8  ;;  %v1165_v52 = vcombine.high %v1992_v49, %v1992_v49 }
 0x181   : > { %v798_v56 = vsel %vm797_vm4, %v791_v34, %v796_v55  ;;  %v703_v57 = vpop.permute.xlu1 %702  ;;  %v1039_v34 = vld [vmem:[#allocation2] sm:$0x77]  ;;  %vm692_vm4 = vcmask 941056  }
 0x182   : > { %800 = vst [vmem:[#allocation3 + $0x88] sm:$0x77] %v798_v56  ;;  %v705_v44 = vrot.slane %v703_v57, 4  ;;  %v990_v47 = vpop.permute.xlu0 %989  ;;  %v1043_v42 = vrot.slane %v1039_v34, 7  ;;  %1478 = vmatprep.mubr.msk.bf16.mxu0 %vm1272_vm12, %v1165_v52  ;;  %v1151_v56 = vld [vmem:[%s2107_s3] sm:$0x7] }
 0x183   : > { %574 = vrot.lane.b32.xlu1 %v567_v59, %s1667_s6  ;;  %v997_v15 = vrot.slane %v990_v47, 4  ;;  %vm1121_vm12 = vcmask 343040  }
 0x184   : > { %v706_v3 = vsel %vm550_vm1, %v704_v63, %v705_v44  ;;  %1083 = vrot.lane.b32.xlu0 %v1077_v1, %s1669_s8 }
 0x185   : > { %v708_v5 = vsel %vm707_vm5, %v701_v39, %v706_v3  ;;  %v613_v9 = vpop.permute.xlu1 %612  ;;  %vm602_vm5 = vcmask 998400  }
 0x186   : > { %710 = vst [vmem:[#allocation3 + $0x78] sm:$0x77] %v708_v5  ;;  %v615_v61 = vrot.slane %v613_v9, 4  ;;  %v900_v2 = vpop.permute.xlu0 %899 }
 0x187   : > { %544 = vrot.lane.b32.xlu1 %v537_v14, %s1666_s5  ;;  %v907_v4 = vrot.slane %v900_v2, 4 }
 0x188   : > { %v616_v21 = vsel %vm550_vm1, %v614_v17, %v615_v61  ;;  %1108 = vrot.lane.b32.xlu0 %v1104_v20, %s1670_s9 }
 0x189   : > { %v618_v22 = vsel %vm617_vm6, %v611_v53, %v616_v21  ;;  %v958_v24 = vpop.permute.xlu1 %957  ;;  %vm642_vm6 = vcmask 982016  }
 0x18a   : > { %620 = vst [vmem:[#allocation3 + $0x18] sm:$0x77] %v618_v22  ;;  %v960_v58 = vrot.slane %v958_v24, 4  ;;  %v929_v60 = vpop.permute.xlu0 %928 }
 0x18b   : > { %1114 = vrot.lane.b32.xlu1 %v1107_v25, %s1670_s9  ;;  %v936_v10 = vrot.slane %v929_v60, 4 }
 0x18c   : > { %v961_v28 = vsel %vm550_vm1, %v959_v26, %v960_v58  ;;  %993 = vrot.lane.b32.xlu0 %v987_v27, %s1653_s11 }
 0x18d   : > { %v963_v12 = vsel %vm962_vm7, %v1929_v30, %v961_v28  ;;  %v992_v8 = vpop.permute.xlu1 %991  ;;  %vm552_vm7 = vcmask 1039360  }
 0x18e   : > { %965 = vst [vmem:[#allocation3 + $0x98] sm:$0xee] %v963_v12  ;;  %v998_v31 = vrot.slane %v992_v8, 4  ;;  %v839_v32 = vpop.permute.xlu0 %838 }
 0x18f   : > { %1085 = vrot.lane.b32.xlu1 %v1078_v11, %s1669_s8  ;;  %v846_v46 = vrot.slane %v839_v32, 4 }
 0x190   : > { %v1001_v0 = vsel %vm550_vm1, %v997_v15, %v998_v31  ;;  %1018 = vrot.lane.b32.xlu0 %v1014_v62, %s1671_s10 }
 0x191   : > { %v1003_v20 = vsel %vm1002_vm8, %v990_v47, %v1001_v0  ;;  %v902_v30 = vpop.permute.xlu1 %901 }
 0x192   : > { %1008 = vst [vmem:[#allocation3 + $0x58] sm:$0x88] %v1003_v20  ;;  %v908_v6 = vrot.slane %v902_v30, 4  ;;  %v866_v16 = vpop.permute.xlu0 %865 }
 0x193   : > { %995 = vrot.lane.b32.xlu1 %v988_v23, %s1653_s11  ;;  %s1672_s11 = smov 48   ;;  %v869_v53 = vrot.slane %v866_v16, 4 }
 0x194   : > { %v911_v33 = vsel %vm550_vm1, %v907_v4, %v908_v6  ;;  %1022 = vrot.lane.b32.xlu0 %v1016_v19, %s1671_s10 }
 0x195   : > { %v913_v35 = vsel %vm912_vm9, %v900_v2, %v911_v33  ;;  %v931_v37 = vpop.permute.xlu1 %930 }
 0x196   : > { %918 = vst [vmem:[#allocation3 + $0x60] sm:$0x88] %v913_v35  ;;  %v937_v38 = vrot.slane %v931_v37, 4  ;;  %v776_v41 = vpop.permute.xlu0 %775 }
 0x197   : > { %1024 = vrot.lane.b32.xlu1 %v1017_v7, %s1671_s10  ;;  %v779_v44 = vrot.slane %v776_v41, 4 }
 0x198   : > { %v940_v36 = vsel %vm550_vm1, %v936_v10, %v937_v38  ;;  %1045 = vrot.lane.b32.xlu0 %v1043_v42, %s1672_s11 }
 0x199   : > { %v942_v39 = vsel %vm941_vm10, %v929_v60, %v940_v36  ;;  %v841_v43 = vpop.permute.xlu1 %840 }
 0x19a   : > { %947 = vst [vmem:[#allocation3 + $0x90] sm:$0xcc] %v942_v39  ;;  %v847_v13 = vrot.slane %v841_v43, 4  ;;  %v810_v18 = vpop.permute.xlu0 %809 }
 0x19b   : > { %1047 = vrot.lane.b32.xlu1 %v1044_v45, %s1672_s11  ;;  %v817_v14 = vrot.slane %v810_v18, 4 }
 0x19c   : > { %v850_v48 = vsel %vm550_vm1, %v846_v46, %v847_v13  ;;  %1154 = vperm.xlu0 %1572, %v1151_v56  }
 0x19d   : > { %v852_v50 = vsel %vm851_vm11, %v839_v32, %v850_v48  ;;  %v868_v51 = vpop.permute.xlu1 %867 }
 0x19e   : > { %857 = vst [vmem:[#allocation3 + $0x28] sm:$0xcc] %v852_v50  ;;  %v870_v54 = vrot.slane %v868_v51, 4  ;;  %v720_v55 = vpop.permute.xlu0 %719 }
 0x19f   : > { %v727_v24 = vrot.slane %v720_v55, 4 }
 0x1a0   : > { %v871_v57 = vsel %vm550_vm1, %v869_v53, %v870_v54 }
 0x1a1   : > { %v873_v59 = vsel %vm872_vm13, %v866_v16, %v871_v57  ;;  %v778_v63 = vpop.permute.xlu1 %777  ;;  %vm1031_vm13 = vcmask 400384  }
 0x1a2   : > { %875 = vst [vmem:[#allocation3 + $0x40] sm:$0xee] %v873_v59  ;;  %v780_v47 = vrot.slane %v778_v63, 4  ;;  %v749_v1 = vpop.permute.xlu0 %748 }
 0x1a3   : > { %v756_v28 = vrot.slane %v749_v1, 4 }
 0x1a4   : > { %v781_v3 = vsel %vm550_vm1, %v779_v44, %v780_v47 }
 0x1a5   : > { %v783_v5 = vsel %vm782_vm14, %v776_v41, %v781_v3  ;;  %v812_v9 = vpop.permute.xlu1 %811  ;;  %vm1052_vm14 = vcmask 392192  }
 0x1a6   : > { %785 = vst [vmem:[#allocation3 + $0x8] sm:$0xee] %v783_v5  ;;  %v818_v17 = vrot.slane %v812_v9, 4  ;;  %v659_v61 = vpop.permute.xlu0 %658 }
 0x1a7   : > { %v666_v31 = vrot.slane %v659_v61, 4 }
 0x1a8   : > { %v821_v2 = vsel %vm550_vm1, %v817_v14, %v818_v17 }
 0x1a9   : > { %v823_v21 = vsel %vm822_vm15, %v810_v18, %v821_v2  ;;  %v722_v22 = vpop.permute.xlu1 %721 }
 0x1aa   : > { %828 = vst [vmem:[#allocation3 + $0x88] sm:$0x88] %v823_v21  ;;  %v728_v25 = vrot.slane %v722_v22, 4  ;;  %v686_v26 = vpop.permute.xlu0 %685 }
 0x1ab   : > { %v689_v23 = vrot.slane %v686_v26, 4 }
 0x1ac   : > { %v731_v58 = vsel %vm550_vm1, %v727_v24, %v728_v25 }
 0x1ad   : > { %v733_v60 = vsel %vm732_vm0, %v720_v55, %v731_v58  ;;  %v751_v27 = vpop.permute.xlu1 %750 }
 0x1ae   : > { %738 = vst [vmem:[#allocation3 + $0x78] sm:$0x88] %v733_v60  ;;  %v757_v29 = vrot.slane %v751_v27, 4  ;;  %v596_v12 = vpop.permute.xlu0 %595 }
 0x1af   : > { %v599_v34 = vrot.slane %v596_v12, 4 }
 0x1b0   : > { %v760_v8 = vsel %vm550_vm1, %v756_v28, %v757_v29 }
 0x1b1   : > { %v762_v11 = vsel %vm761_vm2, %v749_v1, %v760_v8  ;;  %v661_v15 = vpop.permute.xlu1 %660 }
 0x1b2   : > { %767 = vst [vmem:[#allocation3 + $0x80] sm:$0xcc] %v762_v11  ;;  %v667_v32 = vrot.slane %v661_v15, 4  ;;  %v630_v62 = vpop.permute.xlu0 %629 }
 0x1b3   : > { %v637_v40 = vrot.slane %v630_v62, 4 }
 0x1b4   : > { %v670_v0 = vsel %vm550_vm1, %v666_v31, %v667_v32 }
 0x1b5   : > { %v672_v20 = vsel %vm671_vm3, %v659_v61, %v670_v0  ;;  %v688_v30 = vpop.permute.xlu1 %687 }
 0x1b6   : > { %677 = vst [vmem:[#allocation3 + $0x30] sm:$0xcc] %v672_v20  ;;  %v690_v4 = vrot.slane %v688_v30, 4  ;;  %v539_v6 = vpop.permute.xlu0 %538 }
 0x1b7   : > { %v546_v45 = vrot.slane %v539_v6, 4 }
 0x1b8   : > { %v691_v16 = vsel %vm550_vm1, %v689_v23, %v690_v4 }
 0x1b9   : > { %v693_v19 = vsel %vm692_vm4, %v686_v26, %v691_v16  ;;  %v598_v33 = vpop.permute.xlu1 %597 }
 0x1ba   : > { %695 = vst [vmem:[#allocation3 + $0x68] sm:$0xee] %v693_v19  ;;  %v600_v35 = vrot.slane %v598_v33, 4  ;;  %v933_v37 = vpop.permute.xlu0 %932 }
 0x1bb   : > { %v938_v60 = vrot.slane %v933_v37, 4 }
 0x1bc   : > { %v601_v7 = vsel %vm550_vm1, %v599_v34, %v600_v35 }
 0x1bd   : > { %v603_v10 = vsel %vm602_vm5, %v596_v12, %v601_v7  ;;  %v632_v38 = vpop.permute.xlu1 %631 }
 0x1be   : > { %605 = vst [vmem:[#allocation3 + $0x50] sm:$0xee] %v603_v10  ;;  %v638_v41 = vrot.slane %v632_v38, 4  ;;  %v904_v42 = vpop.permute.xlu0 %903 }
 0x1bf   : > { %v909_v47 = vrot.slane %v904_v42, 4 }
 0x1c0   : > { %v641_v36 = vsel %vm550_vm1, %v637_v40, %v638_v41 }
 0x1c1   : > { %v643_v39 = vsel %vm642_vm6, %v630_v62, %v641_v36  ;;  %v541_v43 = vpop.permute.xlu1 %540 }
 0x1c2   : > { %648 = vst [vmem:[#allocation3 + $0x18] sm:$0x88] %v643_v39  ;;  %v547_v46 = vrot.slane %v541_v43, 4  ;;  %v814_v13 = vpop.permute.xlu0 %813 }
 0x1c3   : > { %v819_v17 = vrot.slane %v814_v13, 4 }
 0x1c4   : > { %v551_v18 = vsel %vm550_vm1, %v546_v45, %v547_v46 }
 0x1c5   : > { %v553_v48 = vsel %vm552_vm7, %v539_v6, %v551_v18  ;;  %v571_v50 = vpop.permute.xlu1 %570 }
 0x1c6   : > { %558 = vst [vmem:[#allocation3] sm:$0x88] %v553_v48  ;;  %v843_v51 = vpop.permute.xlu0 %842  ;;  %v577_v62 = vrot.slane %v571_v50, 4 }
 0x1c7   : > { %v848_v25 = vrot.slane %v843_v51, 4 }
 0x1c9   : > { %v2016_v52 = vpop.permute.xlu1 %1062 }
 0x1ca   : > { %v753_v53 = vpop.permute.xlu0 %752  ;;  %v1065_v38 = vrot.slane %v2016_v52, 4 }
 0x1cb   : > { %v758_v8 = vrot.slane %v753_v53, 4 }
 0x1cd   : > { %v2018_v54 = vpop.permute.xlu1 %1081 }
 0x1ce   : > { %v724_v55 = vpop.permute.xlu0 %723 }
 0x1cf   : > { %v729_v4 = vrot.slane %v724_v55, 4 }
 0x1d1   : > { %v2020_v56 = vpop.permute.xlu1 %1110 }
 0x1d2   : > { %v634_v57 = vpop.permute.xlu0 %633 }
 0x1d3   : > { %v639_v7 = vrot.slane %v634_v57, 4 }
 0x1d5   : > { %v2022_v59 = vpop.permute.xlu1 %1020 }
 0x1d6   : > { %v2024_v63 = vpop.permute.xlu0 %662 }
 0x1d7   : > { %v668_v18 = vrot.slane %v2024_v63, 4 }
 0x1d9   : > { %v906_v44 = vpop.permute.xlu1 %905 }
 0x1da   : > { %v910_v1 = vrot.slane %v906_v44, 4  ;;  %v2026_v3 = vpop.permute.xlu0 %572 }
 0x1dc   : > { %v914_v5 = vsel %vm550_vm1, %v909_v47, %v910_v1 }
 0x1dd   : > { %v915_v9 = vsel %vm912_vm9, %v904_v42, %v914_v5  ;;  %v816_v14 = vpop.permute.xlu1 %815  ;;  %vm581_vm9 = vcmask 1031168   ;;  %v1145_v42 = vld [vmem:[#allocation3 + $0x58] sm:$0xff] }
 0x1de   : > { %919 = vst [vmem:[#allocation3 + $0x90] sm:$0x33] %v915_v9  ;;  %v820_v61 = vrot.slane %v816_v14, 4  ;;  %v2030_v2 = vpop.permute.xlu0 %542  ;;  %v578_v9 = vrot.slane %v2026_v3, 4 }
 0x1e0   : > { %v824_v21 = vsel %vm550_vm1, %v819_v17, %v820_v61 }
 0x1e1   : > { %v825_v22 = vsel %vm822_vm15, %v814_v13, %v824_v21  ;;  %v845_v24 = vpop.permute.xlu1 %844 }
 0x1e2   : > { %829 = vst [vmem:[#allocation3 + $0x28] sm:$0x33] %v825_v22  ;;  %v849_v26 = vrot.slane %v845_v24, 4  ;;  %v935_v58 = vpop.permute.xlu0 %934 }
 0x1e3   : > { %v939_v28 = vrot.slane %v935_v58, 4  ;;  %v1139_v58 = vld [vmem:[#allocation3 + $0x88] sm:$0xff] }
 0x1e4   : > { %v853_v27 = vsel %vm550_vm1, %v848_v25, %v849_v26 }
 0x1e5   : > { %v854_v29 = vsel %vm851_vm11, %v843_v51, %v853_v27  ;;  %v755_v12 = vpop.permute.xlu1 %754  ;;  %v943_v11 = vsel %vm550_vm1, %v938_v60, %v939_v28  ;;  %v1581_v51 = vld [vmem:[#allocation3 + $0x64] ss:$48 sps:$4 sm:$0xff]   ;;  %vm1092_vm11 = vcmask 351232   ;;  %v1583_v5 = vld [vmem:[#allocation3 + $0x60] ss:$48 sps:$4 sm:$0xff]   ;;  %v548_v60 = vrot.slane %v2030_v2, 4 }
 0x1e6   : > { %858 = vst [vmem:[#allocation3 + $0x40] sm:$0x11] %v854_v29  ;;  %v759_v15 = vrot.slane %v755_v12, 4  ;;  %v944_v31 = vsel %vm941_vm10, %v933_v37, %v943_v11  ;;  %v569_v32 = vpop.permute.xlu0 %568  ;;  %vm1067_vm10 = vcmask 359424   ;;  %v1117_v12 = vrot.slane %v2020_v56, 4 }
 0x1e7   : > { %948 = vst [vmem:[#allocation3 + $0x98] sm:$0x11] %v944_v31  ;;  %v576_v20 = vrot.slane %v569_v32, 4 }
 0x1e8   : > { %v763_v0 = vsel %vm550_vm1, %v758_v8, %v759_v15 }
 0x1e9   : > { %v764_v30 = vsel %vm761_vm2, %v753_v53, %v763_v0  ;;  %v726_v23 = vpop.permute.xlu1 %725  ;;  %v580_v6 = vsel %vm550_vm1, %v576_v20, %v577_v62 }
 0x1ea   : > { %768 = vst [vmem:[#allocation3 + $0x8] sm:$0x11] %v764_v30  ;;  %v730_v16 = vrot.slane %v726_v23, 4  ;;  %v582_v19 = vsel %vm581_vm9, %v569_v32, %v580_v6  ;;  %v2042_v33 = vpop.permute.xlu0 %1112 }
 0x1eb   : > { %587 = vst [vmem:[#allocation3 + $0x38] sm:$0xcc] %v582_v19  ;;  %v1118_v32 = vrot.slane %v2042_v33, 4 }
 0x1ec   : > { %v734_v34 = vsel %vm550_vm1, %v729_v4, %v730_v16 }
 0x1ed   : > { %v735_v35 = vsel %vm732_vm0, %v724_v55, %v734_v34  ;;  %v636_v37 = vpop.permute.xlu1 %635  ;;  %v1088_v55 = vrot.slane %v2018_v54, 4  ;;  %v1584_v61 = vld [vmem:[#allocation3 + $0x2c] ss:$24 sps:$4 sm:$0xff]   ;;  %v1586_v26 = vld [vmem:[#allocation3 + $0x28] ss:$24 sps:$4 sm:$0xff]  }
 0x1ee   : > { %739 = vst [vmem:[#allocation3 + $0x80] sm:$0x33] %v735_v35  ;;  %v640_v10 = vrot.slane %v636_v37, 4  ;;  %v1061_v40 = vpop.permute.xlu0 %1060  ;;  %v1144_v41 = vld [vmem:[#allocation3 + $0x98] sm:$0xff]  ;;  %v1027_v37 = vrot.slane %v2022_v59, 4 }
 0x1ef   : > { %v1064_v39 = vrot.slane %v1061_v40, 4  ;;  %v1470_v43 = vcombine.high %v1144_v41, %v1145_v42  ;;  %v1469_v45 = vcombine.low %v1144_v41, %v1145_v42 }
 0x1f0   : > { %v644_v36 = vsel %vm550_vm1, %v639_v7, %v640_v10 }
 0x1f1   : > { %v645_v46 = vsel %vm642_vm6, %v634_v57, %v644_v36  ;;  %v665_v13 = vpop.permute.xlu1 %664  ;;  %v1066_v48 = vsel %vm550_vm1, %v1064_v39, %v1065_v38  ;;  %1283 = vmatprep.subr.bf16.mxu0 %v1470_v43  ;;  %v1138_v22 = vld [vmem:[#allocation3 + $0x8] sm:$0xff] }
 0x1f2   : > { %649 = vst [vmem:[#allocation3 + $0x30] sm:$0x33] %v645_v46  ;;  %v669_v50 = vrot.slane %v665_v13, 4  ;;  %v1068_v52 = vsel %vm1067_vm10, %v1061_v40, %v1066_v48  ;;  %v1080_v53 = vpop.permute.xlu0 %1079  ;;  %1284 = vmatpush1.bf16.msra.mxu0 %v1469_v45  ;;  %v1464_v28 = vcombine.high %v1138_v22, %v1139_v58  ;;  %v1463_v31 = vcombine.low %v1138_v22, %v1139_v58 }
 0x1f3   : > { %1070 = vst [vmem:[#allocation3 + $0x70] sm:$0x77] %v1068_v52  ;;  %v1087_v57 = vrot.slane %v1080_v53, 4  ;;  %1285 = vmatprep.subr.bf16.mxu0 %v1581_v51 }
 0x1f4   : > { %v673_v44 = vsel %vm550_vm1, %v668_v18, %v669_v50 }
 0x1f5   : > { %v674_v47 = vsel %vm671_vm3, %v2024_v63, %v673_v44  ;;  %v575_v1 = vpop.permute.xlu1 %574  ;;  %v1091_v14 = vsel %vm550_vm1, %v1087_v57, %v1088_v55  ;;  %v1587_v20 = vld [vmem:[#allocation3 + $0x7c] ss:$8 sps:$4 sm:$0xff]   ;;  %v1589_v6 = vld [vmem:[#allocation3 + $0x78] ss:$8 sps:$4 sm:$0xff]  }
 0x1f6   : > { %678 = vst [vmem:[#allocation3 + $0x68] sm:$0x11] %v674_v47  ;;  %v579_v17 = vrot.slane %v575_v1, 4  ;;  %v1093_v54 = vsel %vm1092_vm11, %v1080_v53, %v1091_v14  ;;  %v1084_v21 = vpop.permute.xlu0 %1083  ;;  %1286 = vmatpush1.bf16.msra.mxu0 %v1583_v5 }
 0x1f7   : > { %1098 = vst [vmem:[#allocation3 + $0x70] sm:$0x88] %v1093_v54  ;;  %1287 = vmatprep.subr.bf16.mxu0 %v1584_v61  ;;  %v1089_v16 = vrot.slane %v1084_v21, 4 }
 0x1f8   : > { %v583_v24 = vsel %vm550_vm1, %v578_v9, %v579_v17 }
 0x1f9   : > { %v584_v63 = vsel %vm581_vm9, %v2026_v3, %v583_v24  ;;  %v545_v25 = vpop.permute.xlu1 %544 }
 0x1fa   : > { %588 = vst [vmem:[#allocation3 + $0x50] sm:$0x11] %v584_v63  ;;  %v549_v27 = vrot.slane %v545_v25, 4  ;;  %v1109_v29 = vpop.permute.xlu0 %1108  ;;  %1288 = vmatpush1.bf16.msra.mxu0 %v1586_v26 }
 0x1fb   : > { %v1116_v11 = vrot.slane %v1109_v29, 4  ;;  %1289 = vmatprep.subr.bf16.mxu0 %v1464_v28 }
 0x1fc   : > { %v554_v8 = vsel %vm550_vm1, %v548_v60, %v549_v27 }
 0x1fd   : > { %v555_v3 = vsel %vm552_vm7, %v2030_v2, %v554_v8  ;;  %v1115_v15 = vpop.permute.xlu1 %1114  ;;  %v1120_v62 = vsel %vm550_vm1, %v1116_v11, %v1117_v12  ;;  %v1590_v34 = vld [vmem:[#allocation3 + $0x34] ss:$56 sps:$4 sm:$0xff]   ;;  %v1592_v41 = vld [vmem:[#allocation3 + $0x30] ss:$56 sps:$4 sm:$0xff]  }
 0x1fe   : > { %559 = vst [vmem:[#allocation3 + $0x38] sm:$0x33] %v555_v3  ;;  %v1119_v0 = vrot.slane %v1115_v15, 4  ;;  %v1122_v30 = vsel %vm1121_vm12, %v1109_v29, %v1120_v62  ;;  %v994_v56 = vpop.permute.xlu0 %993  ;;  %1290 = vmatpush1.bf16.msra.mxu0 %v1463_v31 }
 0x1ff   : > { %1127 = vst [vmem:[#allocation3 + $0x10] sm:$0xcc] %v1122_v30  ;;  %1291 = vmatprep.subr.bf16.mxu0 %v1587_v20 }
 0x200   : > { %v1123_v23 = vsel %vm550_vm1, %v1118_v32, %v1119_v0 }
 0x201   : > { %v1124_v2 = vsel %vm1121_vm12, %v2042_v33, %v1123_v23  ;;  %v1086_v4 = vpop.permute.xlu1 %1085  ;;  %v999_v33 = vrot.slane %v994_v56, 4  ;;  %v1593_v39 = vld [vmem:[#allocation3 + $0x54] ss:$-56 sps:$4 sm:$0xff]   ;;  %v1595_v18 = vld [vmem:[#allocation3 + $0x50] ss:$-56 sps:$4 sm:$0xff]  }
 0x202   : > { %1128 = vst [vmem:[#allocation3 + $0xa0] sm:$0x11] %v1124_v2  ;;  %v1090_v19 = vrot.slane %v1086_v4, 4  ;;  %v1019_v35 = vpop.permute.xlu0 %1018  ;;  %1292 = vmatpush1.bf16.msra.mxu0 %v1589_v6 }
 0x203   : > { %v1026_v10 = vrot.slane %v1019_v35, 4  ;;  %1293 = vmatprep.subr.bf16.mxu0 %v1590_v34 }
 0x204   : > { %v1094_v7 = vsel %vm550_vm1, %v1089_v16, %v1090_v19 }
 0x205   : > { %v1095_v38 = vsel %vm1092_vm11, %v1084_v21, %v1094_v7  ;;  %v996_v40 = vpop.permute.xlu1 %995  ;;  %v1030_v42 = vsel %vm550_vm1, %v1026_v10, %v1027_v37  ;;  %v1596_v51 = vld [vmem:[#allocation3 + $0x4] ss:$56 sps:$4 sm:$0xff]   ;;  %v1598_v47 = vld [vmem:[#allocation3] ss:$56 sps:$4 sm:$0xff]   ;;  %v1148_v21 = vld [vmem:[#allocation3 + $0x70] sm:$0xff] }
 0x206   : > { %1099 = vst [vmem:[#allocation3 + $0x10] sm:$0x33] %v1095_v38  ;;  %v1000_v36 = vrot.slane %v996_v40, 4  ;;  %v1032_v43 = vsel %vm1031_vm13, %v1019_v35, %v1030_v42  ;;  %v1023_v45 = vpop.permute.xlu0 %1022  ;;  %1294 = vmatpush1.bf16.msra.mxu0 %v1592_v41 }
 0x207   : > { %1037 = vst [vmem:[#allocation3 + $0x20] sm:$0xcc] %v1032_v43  ;;  %1295 = vmatprep.subr.bf16.mxu0 %v1593_v39  ;;  %v1028_v48 = vrot.slane %v1023_v45, 4 }
 0x208   : > { %v1004_v59 = vsel %vm550_vm1, %v999_v33, %v1000_v36 }
 0x209   : > { %v1005_v46 = vsel %vm1002_vm8, %v994_v56, %v1004_v59  ;;  %v1025_v13 = vpop.permute.xlu1 %1024  ;;  %v1150_v53 = vld [vmem:[#allocation3 + $0xa0] sm:$0x11]  ;;  %vm1276_vm8 = vcmask 1040384  }
 0x20a   : > { %1009 = vst [vmem:[#allocation3 + $0x20] sm:$0x33] %v1005_v46  ;;  %v1029_v50 = vrot.slane %v1025_v13, 4  ;;  %v1046_v52 = vpop.permute.xlu0 %1045  ;;  %1296 = vmatpush1.bf16.msra.mxu0 %v1595_v18  ;;  %v1476_v9 = vcombine.high %v1150_v53, %v1150_v53  ;;  %v1475_v14 = vcombine.low %v1150_v53, %v1150_v53 }
 0x20b   : > { %1297 = vmatprep.subr.bf16.mxu0 %v1596_v51  ;;  %v1049_v1 = vrot.slane %v1046_v52, 4 }
 0x20c   : > { %v1033_v55 = vsel %vm550_vm1, %v1028_v48, %v1029_v50  ;;  %v1278_v22 = vsel %vm1276_vm8, %v1475_v14, 0 }
 0x20d   : > { %v1034_v44 = vsel %vm1031_vm13, %v1023_v45, %v1033_v55  ;;  %v1048_v57 = vpop.permute.xlu1 %1047  ;;  %v1149_v17 = vld [vmem:[#allocation3 + $0x10] sm:$0xff] }
 0x20e   : > { %1038 = vst [vmem:[#allocation3 + $0x48] sm:$0x11] %v1034_v44  ;;  %v1050_v5 = vrot.slane %v1048_v57, 4  ;;  %1298 = vmatpush1.bf16.msra.mxu0 %v1598_v47  ;;  %v1474_v24 = vcombine.high %v1148_v21, %v1149_v17  ;;  %v1473_v63 = vcombine.low %v1148_v21, %v1149_v17 }
 0x20f   : > { %1477 = vmatprep.subr.msk.bf16.mxu0 %vm1276_vm8, %v1476_v9 }
 0x210   : > { %v1051_v61 = vsel %vm550_vm1, %v1049_v1, %v1050_v5 }
 0x211   : > { %v1053_v54 = vsel %vm1052_vm14, %v1046_v52, %v1051_v61 }
 0x212   : > { %1055 = vst [vmem:[#allocation3 + $0x48] sm:$0xee] %v1053_v54  ;;  %1310 = vmatpush2.bf16.msra.mxu0 %v1278_v22 }
 0x213   : > { %1311 = vmatprep.subr.bf16.mxu0 %v1474_v24 }
 0x216   : > { %1312 = vmatpush2.bf16.msra.mxu0 %v1473_v63 }
 0x217   : > { %v1155_v60 = vpop.permute.xlu0 %1154 }
 0x219   : > { %v1601_v25 = vld [vmem:[#allocation3 + $0x24] ss:$40 sps:$4 sm:$0xff]   ;;  %v1603_v26 = vld [vmem:[#allocation3 + $0x20] ss:$40 sps:$4 sm:$0xff]  }
 0x21a   : > { %1313 = vmatprep.subr.bf16.mxu0 %v1601_v25 }
 0x21b   : > { %1314 = vmatpush2.bf16.msra.mxu0 %v1603_v26 }
 0x21e   : > { %1316 = vmatmul.mubr.bf16.vlgmr.msra.gmra.mxu0 %v1992_v49 }
 0x2de   : > { %v1317_v58 = vpop.f32.mrf.mxu0 }
 0x2df   : > { %v1318_v28 = vadd.f32 %v1317_v58, %v1155_v60 }
 0x2e0   : > { %v1319_v27 = vpop.f32.mrf.mxu0 }
 0x2e1   : > { %v1320_v29 = vadd.f32 %v1319_v27, %v1155_v60 }
 0x2e2   : > { %v1321_v12 = vpop.f32.mrf.mxu0 }
 0x2e3   : > { %v1326_v8 = vcombine.low %v1318_v28, %v1320_v29 }
 0x2e4   : > { %v1322_v11 = vpop.f32.mrf.mxu0 }
 0x2e5   : > { %1328 = vst [vmem:[%s236_s29] sm:$0x77] %v1326_v8 }
 0x2e6 PF: > { %s14_s19 = sadd.s32 1, %s1642_s19   ;;  %s2111_s15 = smov %s1634_s17 }
 0x2e7   : > { %p11_p8 = scmp.ge.s32.totalorder %s14_s19, 26   ;;  %s2112_s16 = smov %s1638_s18 }
 0x2e8   : > { %s2113_s17 = smov %s2116_s20  ;;  %s2114_s18 = smov %s2120_s21 }
 0x2e9   :  { %13 = sbr.rel (!%p11_p8) target bundleno = 3 (0x3), region = 70 }

</bundles_post_ra>
